<compile_context>
chip_gen: v6e
topology: v6e:2x2x1
jax: 0.10.0
libtpu: 0.0.40
codegen_flags: <defaults>
</compile_context>

<pallas_src>
import functools

import numpy as np

import jax
import jax.numpy as jnp
from jax.experimental import pallas as pl
from jax.experimental.pallas import tpu as pltpu


_LANE = 128          # lane width (last-dim alignment for dense stores)
_MXU = 256           # v6e/v7x MXU tile depth; harmless extra padding on v5e
_VMEM_HEADROOM = 8 << 20


def _round_up(x, m):
    return (x + m - 1) // m * m


def _vmem_capacity_bytes():
    try:
        return int(pltpu.get_tpu_info().vmem_capacity_bytes)
    except Exception:
        return 64 << 20   # conservative fallback (v7x per-TC VMEM)


def _resident_vmem_needed(Np, Dp, adj_itemsize):
    adj_bytes = Np * Np * adj_itemsize
    emb_bytes = Np * Dp * 4
    # A (single-buffered, gridless) + {E_0 input buf, output buf, e, acc,
    # bf16-cast temp} embedding-sized buffers.
    return adj_bytes + 5 * emb_bytes


# ---------------------------------------------------------------------------
# Resident-A path: single gridless kernel, n_layers unrolled.
# ---------------------------------------------------------------------------

def _make_resident_kernel(n_layers):
    inv = 1.0 / float(n_layers + 1)   # static Python constant -> single vmul

    def kernel(adj_ref, e0_ref, out_ref):
        a = adj_ref[...]                        # (Np, Np) bf16 (or f32), resident
        e = e0_ref[...].astype(jnp.float32)     # (Np, Dp) f32
        acc = e
        for _ in range(n_layers):               # static unroll
            e = jnp.dot(a, e.astype(a.dtype), preferred_element_type=jnp.float32)
            acc = acc + e
        out_ref[...] = (acc * inv).astype(out_ref.dtype)

    return kernel


def _resident_forward(adj_p, e0_p, n_layers):
    Np, Dp = e0_p.shape
    needed = _resident_vmem_needed(Np, Dp, jnp.dtype(adj_p.dtype).itemsize)
    vmem_limit = None
    if needed > (32 << 20):  # above the default scoped limit: raise, capped by HW
        vmem_limit = min(int(needed * 1.1), _vmem_capacity_bytes() - _VMEM_HEADROOM)
    # TODO(synk): overlap the one-time A ingest with layer 1 (stream A tiles
    # into a full-size VMEM scratch via make_async_copy while computing layer 1
    # per tile), and split rows across the two v7x TensorCores.
    return pl.pallas_call(
        _make_resident_kernel(n_layers),
        out_shape=jax.ShapeDtypeStruct((Np, Dp), jnp.float32),
        in_specs=[
            pl.BlockSpec(memory_space=pltpu.MemorySpace.VMEM),  # adjacency
            pl.BlockSpec(memory_space=pltpu.MemorySpace.VMEM),  # E_0
        ],
        out_specs=pl.BlockSpec(memory_space=pltpu.MemorySpace.VMEM),
        compiler_params=pltpu.CompilerParams(vmem_limit_bytes=vmem_limit),
    )(adj_p, e0_p)


# ---------------------------------------------------------------------------
# Streamed-A path: per-layer tiled matmul, A pipelined from HBM.
# ---------------------------------------------------------------------------

def _streamed_layer_kernel(a_ref, e_ref, acc_in_ref, e_out_ref, acc_out_ref,
                           acc_sc):
    k = pl.program_id(1)

    @pl.when(k == 0)
    def _():
        acc_sc[...] = jnp.zeros_like(acc_sc)

    acc_sc[...] += jnp.dot(a_ref[...], e_ref[...].astype(a_ref.dtype),
                           preferred_element_type=jnp.float32)

    @pl.when(k == pl.num_programs(1) - 1)
    def _():
        e_new = acc_sc[...]
        e_out_ref[...] = e_new                       # E_{l+1} row slab
        acc_out_ref[...] = acc_in_ref[...] + e_new   # fused running sum


def _pick_tile(Np, target):
    """Largest multiple of _MXU <= target that divides Np (Np is a multiple of _MXU)."""
    t = max(min(target, Np) - (min(target, Np) % _MXU), _MXU)
    while Np % t:
        t -= _MXU
    return t


def _streamed_forward(adj_p, e0_p, n_layers, tm_target=512, tk_target=1024):
    Np, Dp = e0_p.shape
    tm = _pick_tile(Np, tm_target)
    tk = _pick_tile(Np, tk_target)
    k_steps = Np // tk

    a_spec_kwargs = {}
    if k_steps >= 3:
        # Deeper pipeline on the A stream; most valuable on v5e (lowest HBM BW).
        a_spec_kwargs["pipeline_mode"] = pl.Buffered(3)

    layer = pl.pallas_call(
        _streamed_layer_kernel,
        out_shape=[jax.ShapeDtypeStruct((Np, Dp), jnp.float32),   # E_{l+1}
                   jax.ShapeDtypeStruct((Np, Dp), jnp.float32)],  # running sum
        grid_spec=pltpu.PrefetchScalarGridSpec(
            num_scalar_prefetch=0,
            grid=(Np // tm, k_steps),
            in_specs=[
                pl.BlockSpec((tm, tk), lambda i, k: (i, k), **a_spec_kwargs),  # A
                pl.BlockSpec((tk, Dp), lambda i, k: (k, 0)),                   # E_l
                pl.BlockSpec((tm, Dp), lambda i, k: (i, 0)),                   # acc in
            ],
            out_specs=[
                pl.BlockSpec((tm, Dp), lambda i, k: (i, 0)),
                pl.BlockSpec((tm, Dp), lambda i, k: (i, 0)),
            ],
            scratch_shapes=[pltpu.VMEM((tm, Dp), jnp.float32)],
        ),
        compiler_params=pltpu.CompilerParams(
            dimension_semantics=("parallel", "arbitrary")),
    )

    e, acc = e0_p, e0_p
    for _ in range(n_layers):
        e, acc = layer(adj_p, e, acc)
    return acc * (1.0 / float(n_layers + 1))


# ---------------------------------------------------------------------------
# Public entry points
# ---------------------------------------------------------------------------

def pad_adjacency(norm_adj, adj_dtype=jnp.bfloat16):
    """Pad + cast the normalized adjacency ONCE; cache the result across calls."""
    N = norm_adj.shape[0]
    Np = _round_up(N, _MXU)
    return jnp.zeros((Np, Np), adj_dtype).at[:N, :N].set(norm_adj.astype(adj_dtype))


@functools.partial(jax.jit, static_argnames=("n_layers", "streamed"))
def lightgcn_forward(adj_p, all_emb0, n_layers=3, streamed=None):
    """Mean over {E_0, A E_0, ..., A^L E_0}. `adj_p` must be pre-padded/cast."""
    N, D = all_emb0.shape
    Np = adj_p.shape[0]
    Dp = _round_up(D, _LANE)
    e0_p = (jnp.zeros((Np, Dp), jnp.float32)
            .at[:N, :D].set(all_emb0.astype(jnp.float32)))
    if streamed is None:
        needed = _resident_vmem_needed(Np, Dp, jnp.dtype(adj_p.dtype).itemsize)
        streamed = needed > (_vmem_capacity_bytes() - _VMEM_HEADROOM)
    out_p = (_streamed_forward(adj_p, e0_p, n_layers) if streamed
             else _resident_forward(adj_p, e0_p, n_layers))
    return out_p[:N, :D]


# ---------------------------------------------------------------------------
# Parameter / adjacency construction (plain JAX glue, deterministic)
# ---------------------------------------------------------------------------

def xavier_uniform(key, shape, dtype=jnp.float32):
    fan_in, fan_out = shape
    limit = float(np.sqrt(6.0 / (fan_in + fan_out)))
    return jax.random.uniform(key, shape, dtype, minval=-limit, maxval=limit)


def build_norm_adj_dense(key, n_users, n_items, density=0.1):
    """Dense symmetric-normalized bipartite adjacency D^-1/2 A D^-1/2."""
    N = n_users + n_items
    R = jax.random.bernoulli(key, density, (n_users, n_items)).astype(jnp.float32)
    A = jnp.zeros((N, N), jnp.float32)
    A = A.at[:n_users, n_users:].set(R)
    A = A.at[n_users:, :n_users].set(R.T)
    rowsum = A.sum(axis=1)
    safe = jnp.where(rowsum > 0, rowsum, 1.0)
    d_inv = jnp.where(rowsum > 0, safe ** -0.5, 0.0)
    return (d_inv[:, None] * A) * d_inv[None, :]


class LightGCNRegPallas:
    def __init__(self, n_users, n_items, emb_dim=32, n_layers=3, seed=0,
                 adj_dtype=jnp.bfloat16):
        # TODO(synk): for sub-bf16 adjacency quantization use fp8 (e4m3) on v7x
        # (no integer MXU path) and int8 on v5e/v6e; keep an f32-A option when
        # outputs feed ranking-quality evaluation.
        self.n_users, self.n_items = n_users, n_items
        self.emb_dim, self.n_layers = emb_dim, n_layers
        k = jax.random.PRNGKey(seed)
        k_u, k_i, k_adj = jax.random.split(k, 3)
        self.user_emb = xavier_uniform(k_u, (n_users, emb_dim))
        self.item_emb = xavier_uniform(k_i, (n_items, emb_dim))
        self.user_bias = jnp.zeros((n_users, 1), jnp.float32)  # unused in forward()
        self.item_bias = jnp.zeros((n_items, 1), jnp.float32)  # unused in forward()
        self.mu = 0.0
        # torch.sparse COO adjacency of the reference is densified here; the
        # padded, bf16-cast copy is built once and reused by every forward.
        self.norm_adj = build_norm_adj_dense(k_adj, n_users, n_items)
        self.adj_p = jax.block_until_ready(pad_adjacency(self.norm_adj, adj_dtype))

    def forward(self, streamed=None):
        all_emb0 = jnp.concatenate([self.user_emb, self.item_emb], axis=0)
        out = lightgcn_forward(self.adj_p, all_emb0,
                               n_layers=self.n_layers, streamed=streamed)
        return out[: self.n_users], out[self.n_users:]


def reference_forward_np(norm_adj, all_emb0, n_layers):
    """Ground-truth forward in float64 (matches the PyTorch module semantics)."""
    A = np.asarray(norm_adj, dtype=np.float64)
    e = np.asarray(all_emb0, dtype=np.float64)
    acc = e.copy()
    for _ in range(n_layers):
        e = A @ e
        acc = acc + e
    return acc / (n_layers + 1)


if __name__ == "__main__":
    n_users, n_items, emb_dim, n_layers = 48, 80, 32, 3
    model = LightGCNRegPallas(n_users, n_items, emb_dim=emb_dim,
                              n_layers=n_layers, seed=0)

    all_emb0 = jnp.concatenate([model.user_emb, model.item_emb], axis=0)
    ref = reference_forward_np(model.norm_adj, all_emb0, n_layers)
    ref_users, ref_items = ref[:n_users], ref[n_users:]

    # Resident-A path (default for this size).
    users, items = jax.block_until_ready(model.forward())
    assert np.allclose(np.asarray(users, np.float64), ref_users, rtol=5e-2, atol=5e-3)
    assert np.allclose(np.asarray(items, np.float64), ref_items, rtol=5e-2, atol=5e-3)

    # Streamed-A path (forced) -- exercises the tiled/pipelined fallback used
    # when the adjacency does not fit VMEM.
    users_s, items_s = jax.block_until_ready(model.forward(streamed=True))
    assert np.allclose(np.asarray(users_s, np.float64), ref_users, rtol=5e-2, atol=5e-3)
    assert np.allclose(np.asarray(items_s, np.float64), ref_items, rtol=5e-2, atol=5e-3)

    print("KERNEL_OK")
</pallas_src>

<mosaic_0001>
module attributes {stable_mosaic.version = 11 : i64} {
  func.func @kernel(%arg0: memref<256x256xbf16, #tpu.memory_space<vmem>>, %arg1: memref<256x128xf32, #tpu.memory_space<vmem>>, %arg2: memref<256x128xf32, #tpu.memory_space<vmem>>) attributes {dimension_semantics = [], scalar_prefetch = 0 : i64, scratch_operands = 0 : i64, tpu.core_type = #tpu.core_type<tc>} {
    %c0 = arith.constant 0 : index
    %c0_0 = arith.constant 0 : index
    %0 = vector.load %arg0[%c0, %c0_0] : memref<256x256xbf16, #tpu.memory_space<vmem>>, vector<256x256xbf16>
    %c0_1 = arith.constant 0 : index
    %c0_2 = arith.constant 0 : index
    %1 = vector.load %arg1[%c0_1, %c0_2] : memref<256x128xf32, #tpu.memory_space<vmem>>, vector<256x128xf32>
    %2 = arith.truncf %1 : vector<256x128xf32> to vector<256x128xbf16>
    %cst = arith.constant dense<0.000000e+00> : vector<256x128xf32>
    %3 = tpu.matmul %0, %2, %cst {dimension_numbers = #tpu.dot_dimension_numbers<[1], [0], [0], [1], [0, 0, 1, 1], [], []>} : vector<256x256xbf16>, vector<256x128xbf16>, vector<256x128xf32> -> vector<256x128xf32>
    %4 = arith.addf %1, %3 : vector<256x128xf32>
    %5 = arith.truncf %3 : vector<256x128xf32> to vector<256x128xbf16>
    %cst_3 = arith.constant dense<0.000000e+00> : vector<256x128xf32>
    %6 = tpu.matmul %0, %5, %cst_3 {dimension_numbers = #tpu.dot_dimension_numbers<[1], [0], [0], [1], [0, 0, 1, 1], [], []>} : vector<256x256xbf16>, vector<256x128xbf16>, vector<256x128xf32> -> vector<256x128xf32>
    %7 = arith.addf %4, %6 : vector<256x128xf32>
    %8 = arith.truncf %6 : vector<256x128xf32> to vector<256x128xbf16>
    %cst_4 = arith.constant dense<0.000000e+00> : vector<256x128xf32>
    %9 = tpu.matmul %0, %8, %cst_4 {dimension_numbers = #tpu.dot_dimension_numbers<[1], [0], [0], [1], [0, 0, 1, 1], [], []>} : vector<256x256xbf16>, vector<256x128xbf16>, vector<256x128xf32> -> vector<256x128xf32>
    %10 = arith.addf %7, %9 : vector<256x128xf32>
    %cst_5 = arith.constant 2.500000e-01 : f32
    %11 = vector.broadcast %cst_5 : f32 to vector<256x128xf32>
    %12 = arith.mulf %10, %11 : vector<256x128xf32>
    %c0_6 = arith.constant 0 : index
    %c0_7 = arith.constant 0 : index
    %13 = vector.load %arg2[%c0_6, %c0_7] : memref<256x128xf32, #tpu.memory_space<vmem>>, vector<256x128xf32>
    tpu.vector_store %arg2[%c0_6, %c0_7], %12 {strides = array<i32>} : memref<256x128xf32, #tpu.memory_space<vmem>>, vector<256x128xf32>,
    return
  }
}

</mosaic_0001>

<bundles_post_ra>
// kernel: lightgcn_forward.1
= control target key start
LH: loop header
LB: loop body
LE: loop exit
PB: predicated region body
PF: predicated region fallthrough
CT: control target
= control target key end

     0   :  { %s2344_s1 = inlined_call_operand.vmem [shape: f32[256,128], index: 1, kind: input, shape index: {}]   ;;  %s2345_s0 = inlined_call_operand.vmem [shape: bf16[256,256], index: 0, kind: input, shape index: {}]   ;;  %s2346_s2 = inlined_call_operand.vmem [shape: f32[256,128], index: 2, kind: output, shape index: {}]  }
   0x1   :  { %v1381_v0 = vld [vmem:[%s2344_s1 + $0xf0] sm:$0xff]  ;;  %v1386_v1 = vld [vmem:[%s2344_s1 + $0xf8] sm:$0xff]  ;;  %v1403_v5 = vld [vmem:[%s2344_s1 + $0xe0] sm:$0xff] }
   0x2   :  { %2439 = vst [vmem:[#allocation2_spill] sm:$0xff] %v1381_v0  ;;  %2440 = vst [vmem:[#allocation3_spill] sm:$0xff] %v1386_v1  ;;  %v1391_v2 = vld [vmem:[%s2344_s1 + $0x70] sm:$0xff]  ;;  %v91_v3 = vpack.c.bf16 %v1386_v1, %v1381_v0  ;;  %v1398_v4 = vld [vmem:[%s2344_s1 + $0x78] sm:$0xff] }
   0x3   :  { %2441 = vst [vmem:[#allocation4_spill] sm:$0xff] %v1391_v2  ;;  %2442 = vst [vmem:[#allocation5_spill] sm:$0xff] %v1398_v4  ;;  %v1408_v6 = vld [vmem:[%s2344_s1 + $0xe8] sm:$0xff]  ;;  %v83_v7 = vpack.c.bf16 %v1398_v4, %v1391_v2  ;;  %v1417_v9 = vld [vmem:[%s2344_s1 + $0x60] sm:$0xff] }
   0x4   :  { %2443 = vst [vmem:[#allocation6_spill] sm:$0xff] %v1403_v5  ;;  %2444 = vst [vmem:[#allocation7_spill] sm:$0xff] %v1408_v6  ;;  %v90_v8 = vpack.c.bf16 %v1408_v6, %v1403_v5  ;;  %v1422_v10 = vld [vmem:[%s2344_s1 + $0x68] sm:$0xff]  ;;  %v1427_v11 = vld [vmem:[%s2344_s1 + $0xd0] sm:$0xff]  ;;  %963 = vmatprep.subr.bf16.mxu0 %v91_v3  ;;  %1299 = vmatprep.subr.bf16.mxu1 %v91_v3 }
   0x5   :  { %2445 = vst [vmem:[#allocation8_spill] sm:$0xff] %v1417_v9  ;;  %2446 = vst [vmem:[#allocation9_spill] sm:$0xff] %v1422_v10  ;;  %v1432_v12 = vld [vmem:[%s2344_s1 + $0xd8] sm:$0xff]  ;;  %964 = vmatpush3.bf16.msra.mxu0 %v83_v7  ;;  %1307 = vmatpush3.bf16.msra.mxu1 %v83_v7  ;;  %v82_v13 = vpack.c.bf16 %v1422_v10, %v1417_v9  ;;  %v1441_v15 = vld [vmem:[%s2344_s1 + $0x50] sm:$0xff] }
   0x6   :  { %2447 = vst [vmem:[#allocation10_spill] sm:$0xff] %v1427_v11  ;;  %2448 = vst [vmem:[#allocation11_spill] sm:$0xff] %v1432_v12  ;;  %965 = vmatprep.subr.bf16.mxu0 %v90_v8  ;;  %1300 = vmatprep.subr.bf16.mxu1 %v90_v8  ;;  %v89_v14 = vpack.c.bf16 %v1432_v12, %v1427_v11  ;;  %v1446_v16 = vld [vmem:[%s2344_s1 + $0x58] sm:$0xff]  ;;  %v1451_v17 = vld [vmem:[%s2344_s1 + $0xc0] sm:$0xff] }
   0x7   :  { %2449 = vst [vmem:[#allocation12_spill] sm:$0xff] %v1441_v15  ;;  %2450 = vst [vmem:[#allocation13_spill] sm:$0xff] %v1446_v16  ;;  %v1456_v18 = vld [vmem:[%s2344_s1 + $0xc8] sm:$0xff]  ;;  %v81_v19 = vpack.c.bf16 %v1446_v16, %v1441_v15  ;;  %v1465_v21 = vld [vmem:[%s2344_s1 + $0x40] sm:$0xff] }
   0x8   :  { %2451 = vst [vmem:[#allocation14_spill] sm:$0xff] %v1451_v17  ;;  %2452 = vst [vmem:[#allocation15_spill] sm:$0xff] %v1456_v18  ;;  %v88_v20 = vpack.c.bf16 %v1456_v18, %v1451_v17  ;;  %v1470_v22 = vld [vmem:[%s2344_s1 + $0x48] sm:$0xff]  ;;  %v1475_v23 = vld [vmem:[%s2344_s1 + $0xb0] sm:$0xff] }
   0x9   :  { %966 = vmatpush3.bf16.msra.mxu0 %v82_v13  ;;  %1308 = vmatpush3.bf16.msra.mxu1 %v82_v13  ;;  %2453 = vst [vmem:[#allocation16_spill] sm:$0xff] %v1465_v21  ;;  %2454 = vst [vmem:[#allocation17_spill] sm:$0xff] %v1470_v22  ;;  %v1480_v24 = vld [vmem:[%s2344_s1 + $0xb8] sm:$0xff]  ;;  %v1485_v25 = vld [vmem:[%s2344_s1 + $0x30] sm:$0xff]  ;;  %v80_v27 = vpack.c.bf16 %v1470_v22, %v1465_v21 }
   0xa   :  { %967 = vmatprep.subr.bf16.mxu0 %v89_v14  ;;  %1301 = vmatprep.subr.bf16.mxu1 %v89_v14  ;;  %2455 = vst [vmem:[#allocation18_spill] sm:$0xff] %v1475_v23  ;;  %2456 = vst [vmem:[#allocation19_spill] sm:$0xff] %v1480_v24  ;;  %v1490_v26 = vld [vmem:[%s2345_s0 + $0x4] ss:$8 sps:$4 sm:$0xff]   ;;  %v1497_v28 = vld [vmem:[%s2344_s1 + $0x38] sm:$0xff]  ;;  %v87_v30 = vpack.c.bf16 %v1480_v24, %v1475_v23 }
   0xb   :  { %2457 = vst [vmem:[#allocation20_spill] sm:$0xff] %v1485_v25  ;;  %2458 = vst [vmem:[#allocation21_spill] sm:$0xff] %v1497_v28  ;;  %v1502_v29 = vld [vmem:[%s2345_s0 + $0x84] ss:$8 sps:$4 sm:$0xff]   ;;  %284 = vmatprep.mubr.bf16.mxu0 %v1490_v26  ;;  %v79_v33 = vpack.c.bf16 %v1497_v28, %v1485_v25  ;;  %v1535_v37 = vld [vmem:[%s2344_s1 + $0x90] sm:$0xff] }
   0xc   :  { %2459 = vst [vmem:[#allocation22_spill] sm:$0xff] %v1502_v29  ;;  %v1509_v31 = vld [vmem:[%s2344_s1 + $0xa0] sm:$0xff]  ;;  %v1514_v32 = vld [vmem:[%s2344_s1 + $0xa8] sm:$0xff]  ;;  %348 = vmatprep.mubr.bf16.mxu1 %v1502_v29  ;;  %2464 = vst [vmem:[#allocation27_spill] sm:$0xff] %v1535_v37 }
   0xd   :  { %968 = vmatpush3.bf16.msra.mxu0 %v81_v19  ;;  %1309 = vmatpush3.bf16.msra.mxu1 %v81_v19  ;;  %2460 = vst [vmem:[#allocation23_spill] sm:$0xff] %v1509_v31  ;;  %2461 = vst [vmem:[#allocation24_spill] sm:$0xff] %v1514_v32  ;;  %v1523_v34 = vld [vmem:[%s2344_s1 + $0x20] sm:$0xff]  ;;  %v86_v35 = vpack.c.bf16 %v1514_v32, %v1509_v31  ;;  %v1530_v36 = vld [vmem:[%s2344_s1 + $0x28] sm:$0xff] }
   0xe   :  { %969 = vmatprep.subr.bf16.mxu0 %v88_v20  ;;  %1302 = vmatprep.subr.bf16.mxu1 %v88_v20  ;;  %2462 = vst [vmem:[#allocation25_spill] sm:$0xff] %v1523_v34  ;;  %2463 = vst [vmem:[#allocation26_spill] sm:$0xff] %v1530_v36  ;;  %v1540_v38 = vld [vmem:[%s2344_s1 + $0x98] sm:$0xff]  ;;  %v78_v39 = vpack.c.bf16 %v1530_v36, %v1523_v34  ;;  %v1547_v40 = vld [vmem:[%s2344_s1 + $0x10] sm:$0xff] }
   0xf   :  { %2465 = vst [vmem:[#allocation28_spill] sm:$0xff] %v1540_v38  ;;  %2466 = vst [vmem:[#allocation29_spill] sm:$0xff] %v1547_v40  ;;  %v1552_v41 = vld [vmem:[%s2344_s1 + $0x18] sm:$0xff]  ;;  %v85_v42 = vpack.c.bf16 %v1540_v38, %v1535_v37  ;;  %v1559_v43 = vld [vmem:[%s2344_s1 + $0x80] sm:$0xff] }
  0x10   :  { %2467 = vst [vmem:[#allocation30_spill] sm:$0xff] %v1552_v41  ;;  %2468 = vst [vmem:[#allocation31_spill] sm:$0xff] %v1559_v43  ;;  %v1564_v44 = vld [vmem:[%s2344_s1 + $0x88] sm:$0xff]  ;;  %v77_v45 = vpack.c.bf16 %v1552_v41, %v1547_v40  ;;  %v1571_v46 = vld [vmem:[%s2344_s1] sm:$0xff] }
  0x11   :  { %970 = vmatpush3.bf16.msra.mxu0 %v80_v27  ;;  %1310 = vmatpush3.bf16.msra.mxu1 %v80_v27  ;;  %2469 = vst [vmem:[#allocation32_spill] sm:$0xff] %v1564_v44  ;;  %2470 = vst [vmem:[#allocation33_spill] sm:$0xff] %v1571_v46  ;;  %v84_v47 = vpack.c.bf16 %v1564_v44, %v1559_v43  ;;  %v1578_v48 = vld [vmem:[%s2344_s1 + $0x8] sm:$0xff]  ;;  %v1595_v52 = vld [vmem:[%s2345_s0 + $0x14] ss:$8 sps:$4 sm:$0xff]  }
  0x12   :  { %971 = vmatprep.subr.bf16.mxu0 %v87_v30  ;;  %1303 = vmatprep.subr.bf16.mxu1 %v87_v30  ;;  %2471 = vst [vmem:[#allocation34_spill] sm:$0xff] %v1578_v48  ;;  %v76_v49 = vpack.c.bf16 %v1578_v48, %v1571_v46  ;;  %v1585_v50 = vld [vmem:[%s2345_s0] ss:$8 sps:$4 sm:$0xff]   ;;  %2473 = vst [vmem:[#allocation36_spill] sm:$0xff] %v1595_v52  ;;  %v1600_v53 = vld [vmem:[%s2345_s0 + $0x94] ss:$8 sps:$4 sm:$0xff]  }
  0x13   :  { %v1590_v51 = vld [vmem:[%s2345_s0 + $0x80] ss:$8 sps:$4 sm:$0xff]   ;;  %2474 = vst [vmem:[#allocation37_spill] sm:$0xff] %v1600_v53  ;;  %v1609_v54 = vld [vmem:[%s2345_s0 + $0x10] ss:$8 sps:$4 sm:$0xff]  }
  0x14   :  { %2472 = vst [vmem:[#allocation35_spill] sm:$0xff] %v1590_v51  ;;  %2475 = vst [vmem:[#allocation38_spill] sm:$0xff] %v1609_v54  ;;  %v1614_v55 = vld [vmem:[%s2345_s0 + $0x90] ss:$8 sps:$4 sm:$0xff]   ;;  %v1619_v56 = vld [vmem:[%s2345_s0 + $0x24] ss:$8 sps:$4 sm:$0xff]  }
  0x15   :  { %972 = vmatpush3.bf16.msra.mxu0 %v79_v33  ;;  %1311 = vmatpush3.bf16.msra.mxu1 %v79_v33  ;;  %2476 = vst [vmem:[#allocation39_spill] sm:$0xff] %v1614_v55  ;;  %2477 = vst [vmem:[#allocation40_spill] sm:$0xff] %v1619_v56  ;;  %v1624_v57 = vld [vmem:[%s2345_s0 + $0xa4] ss:$8 sps:$4 sm:$0xff]   ;;  %v1633_v58 = vld [vmem:[%s2345_s0 + $0x20] ss:$8 sps:$4 sm:$0xff]  }
  0x16   :  { %973 = vmatprep.subr.bf16.mxu0 %v86_v35  ;;  %1304 = vmatprep.subr.bf16.mxu1 %v86_v35  ;;  %2478 = vst [vmem:[#allocation41_spill] sm:$0xff] %v1624_v57  ;;  %2479 = vst [vmem:[#allocation42_spill] sm:$0xff] %v1633_v58  ;;  %v1638_v59 = vld [vmem:[%s2345_s0 + $0xa0] ss:$8 sps:$4 sm:$0xff]   ;;  %v1643_v60 = vld [vmem:[%s2345_s0 + $0x34] ss:$8 sps:$4 sm:$0xff]  }
  0x17   :  { %2480 = vst [vmem:[#allocation43_spill] sm:$0xff] %v1638_v59  ;;  %2481 = vst [vmem:[#allocation44_spill] sm:$0xff] %v1643_v60  ;;  %v1648_v61 = vld [vmem:[%s2345_s0 + $0xb4] ss:$8 sps:$4 sm:$0xff]   ;;  %v1657_v62 = vld [vmem:[%s2345_s0 + $0x30] ss:$8 sps:$4 sm:$0xff]  }
  0x18   :  { %2482 = vst [vmem:[#allocation45_spill] sm:$0xff] %v1648_v61  ;;  %2483 = vst [vmem:[#allocation46_spill] sm:$0xff] %v1657_v62  ;;  %v1662_v63 = vld [vmem:[%s2345_s0 + $0xb0] ss:$8 sps:$4 sm:$0xff]   ;;  %v1667_v3 = vld [vmem:[%s2345_s0 + $0x44] ss:$8 sps:$4 sm:$0xff]  }
  0x19   :  { %974 = vmatpush3.bf16.msra.mxu0 %v78_v39  ;;  %1312 = vmatpush3.bf16.msra.mxu1 %v78_v39  ;;  %2484 = vst [vmem:[#allocation47_spill] sm:$0xff] %v1662_v63  ;;  %2485 = vst [vmem:[#allocation48_spill] sm:$0xff] %v1667_v3  ;;  %v1672_v7 = vld [vmem:[%s2345_s0 + $0xc4] ss:$8 sps:$4 sm:$0xff]   ;;  %v1681_v8 = vld [vmem:[%s2345_s0 + $0x40] ss:$8 sps:$4 sm:$0xff]  }
  0x1a   :  { %975 = vmatprep.subr.bf16.mxu0 %v85_v42  ;;  %1305 = vmatprep.subr.bf16.mxu1 %v85_v42  ;;  %2486 = vst [vmem:[#allocation49_spill] sm:$0xff] %v1672_v7  ;;  %2487 = vst [vmem:[#allocation50_spill] sm:$0xff] %v1681_v8  ;;  %v1686_v13 = vld [vmem:[%s2345_s0 + $0xc0] ss:$8 sps:$4 sm:$0xff]   ;;  %v1691_v14 = vld [vmem:[%s2345_s0 + $0x54] ss:$8 sps:$4 sm:$0xff]  }
  0x1b   :  { %2488 = vst [vmem:[#allocation51_spill] sm:$0xff] %v1686_v13  ;;  %2489 = vst [vmem:[#allocation52_spill] sm:$0xff] %v1691_v14  ;;  %v1696_v19 = vld [vmem:[%s2345_s0 + $0xd4] ss:$8 sps:$4 sm:$0xff]   ;;  %v1705_v20 = vld [vmem:[%s2345_s0 + $0x50] ss:$8 sps:$4 sm:$0xff]  }
  0x1c   :  { %2490 = vst [vmem:[#allocation53_spill] sm:$0xff] %v1696_v19  ;;  %2491 = vst [vmem:[#allocation54_spill] sm:$0xff] %v1705_v20  ;;  %v1710_v27 = vld [vmem:[%s2345_s0 + $0xd0] ss:$8 sps:$4 sm:$0xff]   ;;  %v1715_v30 = vld [vmem:[%s2345_s0 + $0x64] ss:$8 sps:$4 sm:$0xff]  }
  0x1d   :  { %976 = vmatpush3.bf16.msra.mxu0 %v77_v45  ;;  %1313 = vmatpush3.bf16.msra.mxu1 %v77_v45  ;;  %2492 = vst [vmem:[#allocation55_spill] sm:$0xff] %v1710_v27  ;;  %2493 = vst [vmem:[#allocation56_spill] sm:$0xff] %v1715_v30  ;;  %v1720_v33 = vld [vmem:[%s2345_s0 + $0xe4] ss:$8 sps:$4 sm:$0xff]   ;;  %v1729_v35 = vld [vmem:[%s2345_s0 + $0x60] ss:$8 sps:$4 sm:$0xff]  }
  0x1e   :  { %977 = vmatprep.subr.bf16.mxu0 %v84_v47  ;;  %1306 = vmatprep.subr.bf16.mxu1 %v84_v47  ;;  %2494 = vst [vmem:[#allocation57_spill] sm:$0xff] %v1720_v33  ;;  %2495 = vst [vmem:[#allocation58_spill] sm:$0xff] %v1729_v35  ;;  %v1734_v39 = vld [vmem:[%s2345_s0 + $0xe0] ss:$8 sps:$4 sm:$0xff]   ;;  %v1739_v42 = vld [vmem:[%s2345_s0 + $0x74] ss:$8 sps:$4 sm:$0xff]  }
  0x1f   :  { %2496 = vst [vmem:[#allocation59_spill] sm:$0xff] %v1734_v39  ;;  %2497 = vst [vmem:[#allocation60_spill] sm:$0xff] %v1739_v42  ;;  %v1744_v45 = vld [vmem:[%s2345_s0 + $0xf4] ss:$8 sps:$4 sm:$0xff]   ;;  %v1753_v47 = vld [vmem:[%s2345_s0 + $0x70] ss:$8 sps:$4 sm:$0xff]  }
  0x20   :  { %2498 = vst [vmem:[#allocation61_spill] sm:$0xff] %v1744_v45  ;;  %2499 = vst [vmem:[#allocation62_spill] sm:$0xff] %v1753_v47 }
  0x21   :  { %978 = vmatpush3.bf16.msra.mxu0 %v76_v49  ;;  %1314 = vmatpush3.bf16.msra.mxu1 %v76_v49  ;;  %v1758_v49 = vld [vmem:[%s2345_s0 + $0xf0] ss:$8 sps:$4 sm:$0xff]  }
  0x22   :  { %2500 = vst [vmem:[#allocation63_spill] sm:$0xff] %v1758_v49 }
  0x24   :  { %285 = vmatmul.mubr.bf16.vlgmr.msra.gmra.mxu0 %v1585_v50  ;;  %349 = vmatmul.mubr.bf16.vlgmr.msra.gmra.mxu1 %v1590_v51 }
  0x25   :  { %292 = vmatprep.mubr.bf16.mxu0 %v1595_v52  ;;  %356 = vmatprep.mubr.bf16.mxu1 %v1600_v53 }
  0x2c   :  { %293 = vmatmul.mubr.bf16.gmra.mxu0 %v1609_v54  ;;  %357 = vmatmul.mubr.bf16.gmra.mxu1 %v1614_v55 }
  0x2d   :  { %300 = vmatprep.mubr.bf16.mxu0 %v1619_v56  ;;  %364 = vmatprep.mubr.bf16.mxu1 %v1624_v57 }
  0x34   :  { %301 = vmatmul.mubr.bf16.gmra.mxu0 %v1633_v58  ;;  %365 = vmatmul.mubr.bf16.gmra.mxu1 %v1638_v59 }
  0x35   :  { %308 = vmatprep.mubr.bf16.mxu0 %v1643_v60  ;;  %372 = vmatprep.mubr.bf16.mxu1 %v1648_v61 }
  0x3c   :  { %309 = vmatmul.mubr.bf16.gmra.mxu0 %v1657_v62  ;;  %373 = vmatmul.mubr.bf16.gmra.mxu1 %v1662_v63 }
  0x3d   :  { %316 = vmatprep.mubr.bf16.mxu0 %v1667_v3  ;;  %380 = vmatprep.mubr.bf16.mxu1 %v1672_v7 }
  0x44   :  { %317 = vmatmul.mubr.bf16.gmra.mxu0 %v1681_v8  ;;  %381 = vmatmul.mubr.bf16.gmra.mxu1 %v1686_v13 }
  0x45   :  { %324 = vmatprep.mubr.bf16.mxu0 %v1691_v14  ;;  %388 = vmatprep.mubr.bf16.mxu1 %v1696_v19 }
  0x4c   :  { %325 = vmatmul.mubr.bf16.gmra.mxu0 %v1705_v20  ;;  %389 = vmatmul.mubr.bf16.gmra.mxu1 %v1710_v27 }
  0x4d   :  { %332 = vmatprep.mubr.bf16.mxu0 %v1715_v30  ;;  %396 = vmatprep.mubr.bf16.mxu1 %v1720_v33 }
  0x54   :  { %333 = vmatmul.mubr.bf16.gmra.mxu0 %v1729_v35  ;;  %397 = vmatmul.mubr.bf16.gmra.mxu1 %v1734_v39 }
  0x55   :  { %340 = vmatprep.mubr.bf16.mxu0 %v1739_v42  ;;  %404 = vmatprep.mubr.bf16.mxu1 %v1744_v45 }
  0x5c   :  { %341 = vmatmul.mubr.bf16.gmra.mxu0 %v1753_v47  ;;  %405 = vmatmul.mubr.bf16.gmra.mxu1 %v1758_v49 }
  0x5d   :  { %493 = vmatprep.mubr.bf16.mxu1 %v1490_v26  ;;  %702 = vmatprep.mubr.bf16.mxu0 %v1490_v26 }
  0xe4   :  { %v979_v1 = vpop.f32.mrf.mxu0  ;;  %v1027_v0 = vpop.f32.mrf.mxu1 }
  0xe6   :  { %v980_v6 = vpop.f32.mrf.mxu0  ;;  %v1028_v5 = vpop.f32.mrf.mxu1 }
  0xe7   :  { %v1764_v12 = vadd.f32 %v980_v6, %v979_v1  ;;  %v1766_v11 = vadd.f32 %v1028_v5, %v1027_v0 }
  0xe8   :  { %v982_v18 = vpop.f32.mrf.mxu0  ;;  %v1030_v17 = vpop.f32.mrf.mxu1 }
  0xea   :  { %v983_v24 = vpop.f32.mrf.mxu0  ;;  %v1031_v23 = vpop.f32.mrf.mxu1 }
  0xeb   :  { %v1768_v32 = vadd.f32 %v983_v24, %v982_v18  ;;  %v1770_v31 = vadd.f32 %v1031_v23, %v1030_v17 }
  0xec   :  { %v985_v38 = vpop.f32.mrf.mxu0  ;;  %v1033_v37 = vpop.f32.mrf.mxu1 }
  0xee   :  { %v986_v1 = vpop.f32.mrf.mxu0  ;;  %v1034_v6 = vpop.f32.mrf.mxu1 }
  0xef   :  { %v1776_v0 = vadd.f32 %v986_v1, %v985_v38  ;;  %v1778_v5 = vadd.f32 %v1034_v6, %v1033_v37 }
  0xf0   :  { %v988_v43 = vpop.f32.mrf.mxu0  ;;  %v1036_v4 = vpop.f32.mrf.mxu1 }
  0xf2   :  { %v989_v18 = vpop.f32.mrf.mxu0  ;;  %v1037_v24 = vpop.f32.mrf.mxu1 }
  0xf3   :  { %v1780_v17 = vadd.f32 %v989_v18, %v988_v43  ;;  %v1782_v23 = vadd.f32 %v1037_v24, %v1036_v4 }
  0xf4   :  { %v991_v2 = vpop.f32.mrf.mxu0  ;;  %v1784_v10 = vpop.f32.mrf.mxu1 }
  0xf6   :  { %v992_v1 = vpop.f32.mrf.mxu0  ;;  %v1790_v37 = vpop.f32.mrf.mxu1 }
  0xf7   :  { %v1792_v6 = vadd.f32 %v992_v1, %v991_v2 }
  0xf8   :  { %v1794_v44 = vpop.f32.mrf.mxu0  ;;  %v1796_v43 = vpop.f32.mrf.mxu1 }
  0xfa   :  { %v1798_v4 = vpop.f32.mrf.mxu0  ;;  %v1800_v18 = vpop.f32.mrf.mxu1 }
  0xfc   :  { %v1802_v24 = vpop.f32.mrf.mxu0  ;;  %v1804_v9 = vpop.f32.mrf.mxu1 }
  0xfe   :  { %v1806_v26 = vpop.f32.mrf.mxu0  ;;  %v1808_v38 = vpop.f32.mrf.mxu1 }
 0x100   :  { %v1810_v16 = vpop.f32.mrf.mxu0  ;;  %v1048_v2 = vpop.f32.mrf.mxu1 }
 0x102   :  { %v1812_v1 = vpop.f32.mrf.mxu0  ;;  %v1049_v15 = vpop.f32.mrf.mxu1 }
 0x104   :  { %v1003_v22 = vpop.f32.mrf.mxu0  ;;  %v1051_v21 = vpop.f32.mrf.mxu1 }
 0x106   :  { %v1004_v28 = vpop.f32.mrf.mxu0  ;;  %v1052_v25 = vpop.f32.mrf.mxu1 }
 0x108   :  { %v1006_v36 = vpop.f32.mrf.mxu0  ;;  %v1054_v34 = vpop.f32.mrf.mxu1 }
 0x10a   :  { %v1007_v41 = vpop.f32.mrf.mxu0  ;;  %v1055_v40 = vpop.f32.mrf.mxu1 }
 0x10c   :  { %v1009_v48 = vpop.f32.mrf.mxu0  ;;  %v1057_v46 = vpop.f32.mrf.mxu1 }
 0x10e   :  { %v1010_v49 = vpop.f32.mrf.mxu0  ;;  %v1058_v45 = vpop.f32.mrf.mxu1 }
 0x110   :  { %v1012_v39 = vpop.f32.mrf.mxu0  ;;  %v1060_v33 = vpop.f32.mrf.mxu1 }
 0x112   :  { %v1013_v27 = vpop.f32.mrf.mxu0  ;;  %v1061_v19 = vpop.f32.mrf.mxu1 }
 0x114   :  { %v1015_v13 = vpop.f32.mrf.mxu0  ;;  %v1063_v7 = vpop.f32.mrf.mxu1 }
 0x116   :  { %v1016_v63 = vpop.f32.mrf.mxu0  ;;  %v1064_v61 = vpop.f32.mrf.mxu1 }
 0x117   :  { %v1824_v56 = vadd.f32 %v1064_v61, %v1063_v7  ;;  %v1840_v61 = vadd.f32 %v1013_v27, %v1012_v39  ;;  %v2504_v27 = vpack.c.bf16 %v1768_v32, %v1764_v12  ;;  %v2508_v39 = vld [vmem:[#allocation42_spill] sm:$0xff] }
 0x118   :  { %v1018_v59 = vpop.f32.mrf.mxu0  ;;  %v1066_v57 = vpop.f32.mrf.mxu1 }
 0x11a   :  { %v1019_v55 = vpop.f32.mrf.mxu0  ;;  %v1067_v53 = vpop.f32.mrf.mxu1 }
 0x11b   :  { %v1814_v20 = vadd.f32 %v1067_v53, %v1066_v57  ;;  %v1830_v53 = vadd.f32 %v1019_v55, %v1018_v59  ;;  %v1832_v57 = vadd.f32 %v1061_v19, %v1060_v33  ;;  %v1848_v59 = vadd.f32 %v1010_v49, %v1009_v48  ;;  %v2506_v33 = vld [vmem:[#allocation38_spill] sm:$0xff] }
 0x11c   :  { %v1021_v51 = vpop.f32.mrf.mxu0  ;;  %v1069_v29 = vpop.f32.mrf.mxu1  ;;  %v1864_v48 = vadd.f32 %v1808_v38, %v1804_v9  ;;  %v1884_v9 = vadd.f32 %v1790_v37, %v1784_v10  ;;  %v2501_v10 = vpack.c.bf16 %v1782_v23, %v1778_v5  ;;  %v2503_v19 = vpack.c.bf16 %v1770_v31, %v1766_v11  ;;  %v2512_v49 = vld [vmem:[#allocation50_spill] sm:$0xff]  ;;  %v2515_v37 = vld [vmem:[#allocation56_spill] sm:$0xff] }
 0x11d   :  { %v2514_v38 = vld [vmem:[#allocation54_spill] sm:$0xff] }
 0x11e   :  { %v1022_v47 = vpop.f32.mrf.mxu0  ;;  %v1070_v42 = vpop.f32.mrf.mxu1 }
 0x11f   :  { %v1816_v3 = vadd.f32 %v1022_v47, %v1021_v51  ;;  %v1818_v62 = vadd.f32 %v1070_v42, %v1069_v29  ;;  %v459_v29 = vpack.c.bf16 %v1814_v20, %v1824_v56  ;;  %v1836_v51 = vadd.f32 %v1016_v63, %v1015_v13  ;;  %v2509_v42 = vld [vmem:[#allocation44_spill] sm:$0xff] }
 0x120   :  { %v1024_v35 = vpop.f32.mrf.mxu0  ;;  %v1072_v30 = vpop.f32.mrf.mxu1  ;;  %v1856_v63 = vadd.f32 %v1049_v15, %v1048_v2  ;;  %v1874_v15 = vadd.f32 %v1800_v18, %v1796_v43  ;;  %v2511_v47 = vld [vmem:[#allocation48_spill] sm:$0xff]  ;;  %v2516_v43 = vld [vmem:[#allocation58_spill] sm:$0xff]  ;;  %v2520_v2 = vld [vmem:[#allocation35_spill] sm:$0xff] }
 0x121   :  { %v451_v7 = vpack.c.bf16 %v1830_v53, %v1836_v51  ;;  %v2518_v18 = vld [vmem:[#allocation62_spill] sm:$0xff] }
 0x122   :  { %v1025_v14 = vpop.f32.mrf.mxu0  ;;  %v1073_v8 = vpop.f32.mrf.mxu1 }
 0x123   :  { %v1820_v60 = vadd.f32 %v1025_v14, %v1024_v35  ;;  %v1822_v58 = vadd.f32 %v1073_v8, %v1072_v30  ;;  %v1838_v8 = vadd.f32 %v1058_v45, %v1057_v46  ;;  %v1844_v14 = vadd.f32 %v1055_v40, %v1054_v34  ;;  %v2505_v30 = vld [vmem:[#allocation36_spill] sm:$0xff]  ;;  %v2510_v45 = vld [vmem:[#allocation46_spill] sm:$0xff] }
 0x124   :  { %v450_v46 = vpack.c.bf16 %v1840_v61, %v1848_v59  ;;  %v1860_v40 = vadd.f32 %v1004_v28, %v1003_v22  ;;  %v456_v22 = vpack.c.bf16 %v1856_v63, %v1864_v48  ;;  %v1880_v28 = vadd.f32 %v1806_v26, %v1802_v24  ;;  %v2507_v35 = vld [vmem:[#allocation40_spill] sm:$0xff]  ;;  %v2519_v24 = vld [vmem:[#allocation22_spill] sm:$0xff] }
 0x125   :  { %v452_v54 = vpack.c.bf16 %v1820_v60, %v1816_v3  ;;  %v460_v52 = vpack.c.bf16 %v1822_v58, %v1818_v62  ;;  %v458_v55 = vpack.c.bf16 %v1832_v57, %v1838_v8  ;;  %v2513_v26 = vld [vmem:[#allocation52_spill] sm:$0xff] }
 0x127   :  { %1075 = vmatprep.subr.bf16.mxu1 %v460_v52  ;;  %v1850_v52 = vadd.f32 %v1052_v25, %v1051_v21  ;;  %v1868_v21 = vadd.f32 %v1812_v1, %v1810_v16  ;;  %v1888_v16 = vadd.f32 %v1798_v4, %v1794_v44  ;;  %v2502_v44 = vpack.c.bf16 %v1780_v17, %v1776_v0  ;;  %v2517_v4 = vld [vmem:[#allocation60_spill] sm:$0xff]  ;;  %v2521_v1 = vld [vmem:[#allocation37_spill] sm:$0xff] }
 0x128   :  { %1076 = vmatpush3.bf16.msra.mxu1 %v452_v54  ;;  %v1852_v54 = vadd.f32 %v1007_v41, %v1006_v36  ;;  %v455_v41 = vpack.c.bf16 %v1874_v15, %v1884_v9 }
 0x129   :  { %1077 = vmatprep.subr.bf16.mxu1 %v459_v29  ;;  %v457_v34 = vpack.c.bf16 %v1844_v14, %v1850_v52  ;;  %v448_v36 = vpack.c.bf16 %v1868_v21, %v1880_v28  ;;  %v447_v13 = vpack.c.bf16 %v1888_v16, %v1792_v6  ;;  %v2522_v29 = vld [vmem:[#allocation39_spill] sm:$0xff] }
 0x12a   :  { %v449_v25 = vpack.c.bf16 %v1852_v54, %v1860_v40 }
 0x12c   :  { %1078 = vmatpush3.bf16.msra.mxu1 %v451_v7  ;;  %v2523_v7 = vld [vmem:[#allocation41_spill] sm:$0xff] }
 0x12d   :  { %1079 = vmatprep.subr.bf16.mxu1 %v458_v55  ;;  %v2524_v55 = vld [vmem:[#allocation43_spill] sm:$0xff] }
 0x130   :  { %1080 = vmatpush3.bf16.msra.mxu1 %v450_v46  ;;  %v2525_v46 = vld [vmem:[#allocation45_spill] sm:$0xff] }
 0x131   :  { %1081 = vmatprep.subr.bf16.mxu1 %v457_v34  ;;  %v2526_v34 = vld [vmem:[#allocation47_spill] sm:$0xff] }
 0x134   :  { %1082 = vmatpush3.bf16.msra.mxu1 %v449_v25  ;;  %v2527_v25 = vld [vmem:[#allocation49_spill] sm:$0xff] }
 0x135   :  { %1083 = vmatprep.subr.bf16.mxu1 %v456_v22  ;;  %v2528_v22 = vld [vmem:[#allocation51_spill] sm:$0xff] }
 0x138   :  { %1084 = vmatpush3.bf16.msra.mxu1 %v448_v36  ;;  %v2529_v36 = vld [vmem:[#allocation53_spill] sm:$0xff] }
 0x139   :  { %1085 = vmatprep.subr.bf16.mxu1 %v455_v41  ;;  %v2530_v41 = vld [vmem:[#allocation55_spill] sm:$0xff] }
 0x13c   :  { %1086 = vmatpush3.bf16.msra.mxu1 %v447_v13  ;;  %v2531_v13 = vld [vmem:[#allocation57_spill] sm:$0xff] }
 0x13d   :  { %1087 = vmatprep.subr.bf16.mxu1 %v2501_v10  ;;  %v2532_v10 = vld [vmem:[#allocation59_spill] sm:$0xff] }
 0x140   :  { %1088 = vmatpush3.bf16.msra.mxu1 %v2502_v44  ;;  %v2533_v44 = vld [vmem:[#allocation61_spill] sm:$0xff] }
 0x141   :  { %1089 = vmatprep.subr.bf16.mxu1 %v2503_v19  ;;  %v2534_v19 = vld [vmem:[#allocation63_spill] sm:$0xff] }
 0x144   :  { %1090 = vmatpush3.bf16.msra.mxu1 %v2504_v27 }
 0x147   :  { %494 = vmatmul.mubr.bf16.vlgmr.msra.gmra.mxu1 %v1585_v50 }
 0x148   :  { %501 = vmatprep.mubr.bf16.mxu1 %v2505_v30 }
 0x14f   :  { %502 = vmatmul.mubr.bf16.gmra.mxu1 %v2506_v33 }
 0x150   :  { %509 = vmatprep.mubr.bf16.mxu1 %v2507_v35 }
 0x157   :  { %510 = vmatmul.mubr.bf16.gmra.mxu1 %v2508_v39 }
 0x158   :  { %517 = vmatprep.mubr.bf16.mxu1 %v2509_v42 }
 0x15f   :  { %518 = vmatmul.mubr.bf16.gmra.mxu1 %v2510_v45 }
 0x160   :  { %525 = vmatprep.mubr.bf16.mxu1 %v2511_v47 }
 0x167   :  { %526 = vmatmul.mubr.bf16.gmra.mxu1 %v2512_v49 }
 0x168   :  { %533 = vmatprep.mubr.bf16.mxu1 %v2513_v26 }
 0x16f   :  { %534 = vmatmul.mubr.bf16.gmra.mxu1 %v2514_v38 }
 0x170   :  { %541 = vmatprep.mubr.bf16.mxu1 %v2515_v37 }
 0x177   :  { %542 = vmatmul.mubr.bf16.gmra.mxu1 %v2516_v43 }
 0x178   :  { %549 = vmatprep.mubr.bf16.mxu1 %v2517_v4 }
 0x17f   :  { %550 = vmatmul.mubr.bf16.gmra.mxu1 %v2518_v18 }
 0x180   :  { %557 = vmatprep.mubr.bf16.mxu1 %v2519_v24 }
 0x187   :  { %558 = vmatmul.mubr.bf16.gmra.mxu1 %v2520_v2 }
 0x188   :  { %565 = vmatprep.mubr.bf16.mxu1 %v2521_v1  ;;  %v2579_v1 = vld [vmem:[#allocation18_spill] sm:$0xff] }
 0x18f   :  { %566 = vmatmul.mubr.bf16.gmra.mxu1 %v2522_v29 }
 0x190   :  { %573 = vmatprep.mubr.bf16.mxu1 %v2523_v7  ;;  %v2537_v7 = vld [vmem:[#allocation34_spill] sm:$0xff] }
 0x197   :  { %574 = vmatmul.mubr.bf16.gmra.mxu1 %v2524_v55  ;;  %v2535_v55 = vld [vmem:[#allocation33_spill] sm:$0xff] }
 0x198   :  { %581 = vmatprep.mubr.bf16.mxu1 %v2525_v46 }
 0x19f   :  { %582 = vmatmul.mubr.bf16.gmra.mxu1 %v2526_v34  ;;  %v413_v34 = vadd.f32 %v1764_v12, %v2535_v55  ;;  %v2539_v55 = vld [vmem:[#allocation29_spill] sm:$0xff] }
 0x1a0   :  { %589 = vmatprep.mubr.bf16.mxu1 %v2527_v25 }
 0x1a7   :  { %590 = vmatmul.mubr.bf16.gmra.mxu1 %v2528_v22 }
 0x1a8   :  { %597 = vmatprep.mubr.bf16.mxu1 %v2529_v36 }
 0x1af   :  { %598 = vmatmul.mubr.bf16.gmra.mxu1 %v2530_v41 }
 0x1b0   :  { %605 = vmatprep.mubr.bf16.mxu1 %v2531_v13  ;;  %v414_v13 = vadd.f32 %v1768_v32, %v2537_v7  ;;  %v2541_v7 = vld [vmem:[#allocation30_spill] sm:$0xff] }
 0x1b7   :  { %606 = vmatmul.mubr.bf16.gmra.mxu1 %v2532_v10 }
 0x1b8   :  { %613 = vmatprep.mubr.bf16.mxu1 %v2533_v44 }
 0x1bf   :  { %614 = vmatmul.mubr.bf16.gmra.mxu1 %v2534_v19 }
 0x207   :  { %v1091_v27 = vpop.f32.mrf.mxu1 }
 0x209   :  { %v1092_v46 = vpop.f32.mrf.mxu1 }
 0x20a   :  { %v1941_v25 = vadd.f32 %v1092_v46, %v1091_v27  ;;  %v415_v46 = vadd.f32 %v1776_v0, %v2539_v55 }
 0x20b   :  { %v1094_v22 = vpop.f32.mrf.mxu1 }
 0x20c   :  { %v1944_v36 = vadd.f32 %v1941_v25, %v413_v34 }
 0x20d   :  { %v1095_v41 = vpop.f32.mrf.mxu1 }
 0x20e   :  { %2536 = vst [vmem:[#allocation36_spill] sm:$0xff] %v1944_v36  ;;  %v1948_v10 = vadd.f32 %v1095_v41, %v1094_v22  ;;  %v416_v22 = vadd.f32 %v1780_v17, %v2541_v7 }
 0x20f   :  { %v1097_v44 = vpop.f32.mrf.mxu1 }
 0x210   :  { %v1951_v19 = vadd.f32 %v1948_v10, %v414_v13 }
 0x211   :  { %v1098_v12 = vpop.f32.mrf.mxu1 }
 0x212   :  { %2538 = vst [vmem:[#allocation38_spill] sm:$0xff] %v1951_v19  ;;  %v1957_v27 = vadd.f32 %v1098_v12, %v1097_v44  ;;  %v2543_v44 = vld [vmem:[#allocation25_spill] sm:$0xff] }
 0x213   :  { %v1100_v34 = vpop.f32.mrf.mxu1  ;;  %v417_v12 = vadd.f32 %v1792_v6, %v2543_v44 }
 0x214   :  { %v1960_v36 = vadd.f32 %v1957_v27, %v415_v46 }
 0x215   :  { %v1101_v32 = vpop.f32.mrf.mxu1 }
 0x216   :  { %2540 = vst [vmem:[#allocation40_spill] sm:$0xff] %v1960_v36  ;;  %v1964_v41 = vadd.f32 %v1101_v32, %v1100_v34  ;;  %v2545_v34 = vld [vmem:[#allocation26_spill] sm:$0xff] }
 0x217   :  { %v1103_v13 = vpop.f32.mrf.mxu1  ;;  %v418_v32 = vadd.f32 %v1888_v16, %v2545_v34 }
 0x218   :  { %v1967_v19 = vadd.f32 %v1964_v41, %v416_v22 }
 0x219   :  { %v1104_v0 = vpop.f32.mrf.mxu1 }
 0x21a   :  { %2542 = vst [vmem:[#allocation42_spill] sm:$0xff] %v1967_v19  ;;  %v1973_v55 = vadd.f32 %v1104_v0, %v1103_v13  ;;  %v2547_v13 = vld [vmem:[#allocation20_spill] sm:$0xff] }
 0x21b   :  { %v1106_v46 = vpop.f32.mrf.mxu1  ;;  %v419_v0 = vadd.f32 %v1880_v28, %v2547_v13 }
 0x21c   :  { %v1976_v36 = vadd.f32 %v1973_v55, %v417_v12 }
 0x21d   :  { %v1107_v17 = vpop.f32.mrf.mxu1 }
 0x21e   :  { %2544 = vst [vmem:[#allocation44_spill] sm:$0xff] %v1976_v36  ;;  %v1980_v7 = vadd.f32 %v1107_v17, %v1106_v46  ;;  %v2549_v46 = vld [vmem:[#allocation21_spill] sm:$0xff] }
 0x21f   :  { %v1109_v22 = vpop.f32.mrf.mxu1  ;;  %v420_v17 = vadd.f32 %v1868_v21, %v2549_v46 }
 0x220   :  { %v1983_v19 = vadd.f32 %v1980_v7, %v418_v32 }
 0x221   :  { %v1110_v6 = vpop.f32.mrf.mxu1 }
 0x222   :  { %2546 = vst [vmem:[#allocation46_spill] sm:$0xff] %v1983_v19  ;;  %v1989_v44 = vadd.f32 %v1110_v6, %v1109_v22  ;;  %v2551_v22 = vld [vmem:[#allocation16_spill] sm:$0xff] }
 0x223   :  { %v1112_v12 = vpop.f32.mrf.mxu1  ;;  %v421_v6 = vadd.f32 %v1860_v40, %v2551_v22 }
 0x224   :  { %v1992_v36 = vadd.f32 %v1989_v44, %v419_v0 }
 0x225   :  { %v1113_v16 = vpop.f32.mrf.mxu1 }
 0x226   :  { %2548 = vst [vmem:[#allocation48_spill] sm:$0xff] %v1992_v36  ;;  %v1996_v34 = vadd.f32 %v1113_v16, %v1112_v12  ;;  %v2553_v12 = vld [vmem:[#allocation17_spill] sm:$0xff] }
 0x227   :  { %v1115_v32 = vpop.f32.mrf.mxu1  ;;  %v422_v16 = vadd.f32 %v1852_v54, %v2553_v12 }
 0x228   :  { %v1999_v19 = vadd.f32 %v1996_v34, %v420_v17 }
 0x229   :  { %v1116_v28 = vpop.f32.mrf.mxu1 }
 0x22a   :  { %2550 = vst [vmem:[#allocation50_spill] sm:$0xff] %v1999_v19  ;;  %v2005_v13 = vadd.f32 %v1116_v28, %v1115_v32  ;;  %v2555_v32 = vld [vmem:[#allocation12_spill] sm:$0xff] }
 0x22b   :  { %v1118_v0 = vpop.f32.mrf.mxu1  ;;  %v423_v28 = vadd.f32 %v1848_v59, %v2555_v32 }
 0x22c   :  { %v2008_v36 = vadd.f32 %v2005_v13, %v421_v6 }
 0x22d   :  { %v1119_v21 = vpop.f32.mrf.mxu1 }
 0x22e   :  { %2552 = vst [vmem:[#allocation52_spill] sm:$0xff] %v2008_v36  ;;  %v2012_v46 = vadd.f32 %v1119_v21, %v1118_v0  ;;  %v2557_v0 = vld [vmem:[#allocation13_spill] sm:$0xff] }
 0x22f   :  { %v1121_v17 = vpop.f32.mrf.mxu1  ;;  %v424_v21 = vadd.f32 %v1840_v61, %v2557_v0 }
 0x230   :  { %v2015_v19 = vadd.f32 %v2012_v46, %v422_v16 }
 0x231   :  { %v1122_v40 = vpop.f32.mrf.mxu1 }
 0x232   :  { %2554 = vst [vmem:[#allocation54_spill] sm:$0xff] %v2015_v19  ;;  %v2021_v22 = vadd.f32 %v1122_v40, %v1121_v17  ;;  %v2559_v17 = vld [vmem:[#allocation8_spill] sm:$0xff] }
 0x233   :  { %v1124_v6 = vpop.f32.mrf.mxu1  ;;  %v425_v40 = vadd.f32 %v1836_v51, %v2559_v17 }
 0x234   :  { %v2024_v36 = vadd.f32 %v2021_v22, %v423_v28 }
 0x235   :  { %v1125_v54 = vpop.f32.mrf.mxu1 }
 0x236   :  { %2556 = vst [vmem:[#allocation56_spill] sm:$0xff] %v2024_v36  ;;  %v2028_v12 = vadd.f32 %v1125_v54, %v1124_v6  ;;  %v2561_v6 = vld [vmem:[#allocation9_spill] sm:$0xff] }
 0x237   :  { %v1127_v16 = vpop.f32.mrf.mxu1  ;;  %v426_v54 = vadd.f32 %v1830_v53, %v2561_v6 }
 0x238   :  { %v2031_v19 = vadd.f32 %v2028_v12, %v424_v21 }
 0x239   :  { %v1128_v59 = vpop.f32.mrf.mxu1 }
 0x23a   :  { %2558 = vst [vmem:[#allocation58_spill] sm:$0xff] %v2031_v19  ;;  %v2037_v32 = vadd.f32 %v1128_v59, %v1127_v16  ;;  %v2563_v16 = vld [vmem:[#allocation4_spill] sm:$0xff] }
 0x23b   :  { %v1130_v28 = vpop.f32.mrf.mxu1  ;;  %v427_v59 = vadd.f32 %v1816_v3, %v2563_v16 }
 0x23c   :  { %v2040_v36 = vadd.f32 %v2037_v32, %v425_v40 }
 0x23d   :  { %v1131_v61 = vpop.f32.mrf.mxu1 }
 0x23e   :  { %2560 = vst [vmem:[#allocation33_spill] sm:$0xff] %v2040_v36  ;;  %v2044_v0 = vadd.f32 %v1131_v61, %v1130_v28  ;;  %v2565_v28 = vld [vmem:[#allocation5_spill] sm:$0xff] }
 0x23f   :  { %v1133_v21 = vpop.f32.mrf.mxu1  ;;  %v428_v61 = vadd.f32 %v1820_v60, %v2565_v28 }
 0x240   :  { %v2047_v19 = vadd.f32 %v2044_v0, %v426_v54 }
 0x241   :  { %v1134_v51 = vpop.f32.mrf.mxu1 }
 0x242   :  { %2562 = vst [vmem:[#allocation34_spill] sm:$0xff] %v2047_v19  ;;  %v2053_v17 = vadd.f32 %v1134_v51, %v1133_v21  ;;  %v2567_v21 = vld [vmem:[#allocation31_spill] sm:$0xff] }
 0x243   :  { %v1136_v40 = vpop.f32.mrf.mxu1  ;;  %v429_v51 = vadd.f32 %v1766_v11, %v2567_v21 }
 0x244   :  { %v2056_v36 = vadd.f32 %v2053_v17, %v427_v59 }
 0x245   :  { %v1137_v53 = vpop.f32.mrf.mxu1 }
 0x246   :  { %2564 = vst [vmem:[#allocation29_spill] sm:$0xff] %v2056_v36  ;;  %v2060_v6 = vadd.f32 %v1137_v53, %v1136_v40  ;;  %v2569_v40 = vld [vmem:[#allocation32_spill] sm:$0xff] }
 0x247   :  { %v1139_v54 = vpop.f32.mrf.mxu1  ;;  %v430_v53 = vadd.f32 %v1770_v31, %v2569_v40 }
 0x248   :  { %v2063_v19 = vadd.f32 %v2060_v6, %v428_v61 }
 0x249   :  { %v1140_v3 = vpop.f32.mrf.mxu1 }
 0x24a   :  { %2566 = vst [vmem:[#allocation30_spill] sm:$0xff] %v2063_v19  ;;  %v2069_v16 = vadd.f32 %v1140_v3, %v1139_v54  ;;  %v2571_v54 = vld [vmem:[#allocation27_spill] sm:$0xff] }
 0x24b   :  { %v1142_v59 = vpop.f32.mrf.mxu1  ;;  %v431_v3 = vadd.f32 %v1778_v5, %v2571_v54 }
 0x24c   :  { %v2072_v36 = vadd.f32 %v2069_v16, %v429_v51 }
 0x24d   :  { %v1143_v60 = vpop.f32.mrf.mxu1 }
 0x24e   :  { %2568 = vst [vmem:[#allocation25_spill] sm:$0xff] %v2072_v36  ;;  %v2076_v28 = vadd.f32 %v1143_v60, %v1142_v59  ;;  %v2573_v59 = vld [vmem:[#allocation28_spill] sm:$0xff] }
 0x24f   :  { %v1145_v61 = vpop.f32.mrf.mxu1  ;;  %v432_v60 = vadd.f32 %v1782_v23, %v2573_v59 }
 0x250   :  { %v2079_v19 = vadd.f32 %v2076_v28, %v430_v53 }
 0x251   :  { %v1146_v11 = vpop.f32.mrf.mxu1 }
 0x252   :  { %2570 = vst [vmem:[#allocation26_spill] sm:$0xff] %v2079_v19  ;;  %v2085_v21 = vadd.f32 %v1146_v11, %v1145_v61  ;;  %v2575_v61 = vld [vmem:[#allocation23_spill] sm:$0xff] }
 0x253   :  { %v1148_v51 = vpop.f32.mrf.mxu1  ;;  %v433_v11 = vadd.f32 %v1884_v9, %v2575_v61  ;;  %v435_v9 = vadd.f32 %v1864_v48, %v2579_v1  ;;  %v2585_v1 = vld [vmem:[#allocation15_spill] sm:$0xff] }
 0x254   :  { %v2088_v36 = vadd.f32 %v2085_v21, %v431_v3 }
 0x255   :  { %v1149_v31 = vpop.f32.mrf.mxu1 }
 0x256   :  { %2572 = vst [vmem:[#allocation20_spill] sm:$0xff] %v2088_v36  ;;  %v2092_v40 = vadd.f32 %v1149_v31, %v1148_v51  ;;  %v2577_v51 = vld [vmem:[#allocation24_spill] sm:$0xff] }
 0x257   :  { %v1151_v53 = vpop.f32.mrf.mxu1  ;;  %v434_v31 = vadd.f32 %v1874_v15, %v2577_v51  ;;  %v2583_v51 = vld [vmem:[#allocation14_spill] sm:$0xff] }
 0x258   :  { %v2095_v19 = vadd.f32 %v2092_v40, %v432_v60 }
 0x259   :  { %v1152_v5 = vpop.f32.mrf.mxu1 }
 0x25a   :  { %2574 = vst [vmem:[#allocation21_spill] sm:$0xff] %v2095_v19  ;;  %v2101_v54 = vadd.f32 %v1152_v5, %v1151_v53 }
 0x25b   :  { %v1154_v3 = vpop.f32.mrf.mxu1 }
 0x25c   :  { %v2104_v36 = vadd.f32 %v2101_v54, %v433_v11 }
 0x25d   :  { %v1155_v23 = vpop.f32.mrf.mxu1 }
 0x25e   :  { %2576 = vst [vmem:[#allocation16_spill] sm:$0xff] %v2104_v36  ;;  %v2108_v59 = vadd.f32 %v1155_v23, %v1154_v3  ;;  %v2581_v36 = vld [vmem:[#allocation19_spill] sm:$0xff] }
 0x25f   :  { %v1157_v60 = vpop.f32.mrf.mxu1  ;;  %v436_v2 = vadd.f32 %v1856_v63, %v2581_v36  ;;  %v2587_v36 = vld [vmem:[#allocation10_spill] sm:$0xff] }
 0x260   :  { %v2111_v19 = vadd.f32 %v2108_v59, %v434_v31  ;;  %v437_v31 = vadd.f32 %v1850_v52, %v2583_v51 }
 0x261   :  { %v1158_v29 = vpop.f32.mrf.mxu1 }
 0x262   :  { %2578 = vst [vmem:[#allocation17_spill] sm:$0xff] %v2111_v19  ;;  %v1159_v53 = vadd.f32 %v1158_v29, %v1157_v60  ;;  %v438_v29 = vadd.f32 %v1844_v14, %v2585_v1 }
 0x263   :  { %v1160_v5 = vpop.f32.mrf.mxu1 }
 0x264   :  { %v2115_v61 = vadd.f32 %v1159_v53, %v435_v9 }
 0x265   :  { %v1161_v11 = vpop.f32.mrf.mxu1 }
 0x266   :  { %2580 = vst [vmem:[#allocation12_spill] sm:$0xff] %v2115_v61  ;;  %v1162_v24 = vadd.f32 %v1161_v11, %v1160_v5 }
 0x267   :  { %v1163_v15 = vpop.f32.mrf.mxu1 }
 0x268   :  { %v2119_v3 = vadd.f32 %v1162_v24, %v436_v2  ;;  %v439_v2 = vadd.f32 %v1838_v8, %v2587_v36 }
 0x269   :  { %v1164_v23 = vpop.f32.mrf.mxu1 }
 0x26a   :  { %2582 = vst [vmem:[#allocation13_spill] sm:$0xff] %v2119_v3  ;;  %v1165_v19 = vadd.f32 %v1164_v23, %v1163_v15  ;;  %v2589_v15 = vld [vmem:[#allocation11_spill] sm:$0xff] }
 0x26b   :  { %v1166_v18 = vpop.f32.mrf.mxu1  ;;  %v440_v23 = vadd.f32 %v1832_v57, %v2589_v15 }
 0x26c   :  { %v2123_v4 = vadd.f32 %v1165_v19, %v437_v31 }
 0x26d   :  { %v1167_v48 = vpop.f32.mrf.mxu1 }
 0x26e   :  { %2584 = vst [vmem:[#allocation8_spill] sm:$0xff] %v2123_v4  ;;  %v1168_v60 = vadd.f32 %v1167_v48, %v1166_v18  ;;  %v2591_v18 = vld [vmem:[#allocation6_spill] sm:$0xff] }
 0x26f   :  { %v1169_v9 = vpop.f32.mrf.mxu1  ;;  %v441_v48 = vadd.f32 %v1824_v56, %v2591_v18 }
 0x270   :  { %v2127_v61 = vadd.f32 %v1168_v60, %v438_v29 }
 0x271   :  { %v1170_v63 = vpop.f32.mrf.mxu1 }
 0x272   :  { %2586 = vst [vmem:[#allocation9_spill] sm:$0xff] %v2127_v61  ;;  %v1171_v5 = vadd.f32 %v1170_v63, %v1169_v9  ;;  %v2592_v9 = vld [vmem:[#allocation7_spill] sm:$0xff] }
 0x273   :  { %v1172_v11 = vpop.f32.mrf.mxu1  ;;  %v442_v63 = vadd.f32 %v1814_v20, %v2592_v9  ;;  %v2596_v9 = vpack.c.bf16 %v2044_v0, %v2037_v32  ;;  %v2599_v32 = vpack.c.bf16 %v1996_v34, %v1989_v44  ;;  %v2604_v44 = vpack.c.bf16 %v1948_v10, %v1941_v25  ;;  %v2618_v25 = vld [vmem:[#allocation55_spill] sm:$0xff]  ;;  %v2619_v10 = vld [vmem:[#allocation57_spill] sm:$0xff]  ;;  %v2623_v0 = vld [vmem:[#allocation36_spill] sm:$0xff] }
 0x274   :  { %v2131_v3 = vadd.f32 %v1171_v5, %v439_v2 }
 0x275   :  { %v1173_v52 = vpop.f32.mrf.mxu1 }
 0x276   :  { %2588 = vst [vmem:[#allocation4_spill] sm:$0xff] %v2131_v3  ;;  %v1174_v51 = vadd.f32 %v1173_v52, %v1172_v11  ;;  %v2593_v11 = vld [vmem:[#allocation2_spill] sm:$0xff] }
 0x277   :  { %v1175_v31 = vpop.f32.mrf.mxu1  ;;  %v443_v52 = vadd.f32 %v1818_v62, %v2593_v11 }
 0x278   :  { %v2135_v4 = vadd.f32 %v1174_v51, %v440_v23  ;;  %v667_v62 = vpack.c.bf16 %v1174_v51, %v1171_v5 }
 0x279   :  { %v1176_v14 = vpop.f32.mrf.mxu1 }
 0x27a   :  { %2590 = vst [vmem:[#allocation5_spill] sm:$0xff] %v2135_v4  ;;  %v1177_v1 = vadd.f32 %v1176_v14, %v1175_v31  ;;  %v2594_v31 = vld [vmem:[#allocation3_spill] sm:$0xff] }
 0x27b   :  { %v1178_v29 = vpop.f32.mrf.mxu1  ;;  %v444_v14 = vadd.f32 %v1822_v58, %v2594_v31  ;;  %v2597_v58 = vpack.c.bf16 %v2028_v12, %v2021_v22 }
 0x27c   :  { %v2139_v61 = vadd.f32 %v1177_v1, %v441_v48 }
 0x27d   :  { %v1179_v8 = vpop.f32.mrf.mxu1 }
 0x27e   :  { %v1180_v36 = vadd.f32 %v1179_v8, %v1178_v29  ;;  %v2595_v8 = vpack.c.bf16 %v2060_v6, %v2053_v17  ;;  %v664_v17 = vpack.c.bf16 %v2108_v59, %v2101_v54  ;;  %v2624_v54 = vld [vmem:[#allocation38_spill] sm:$0xff] }
 0x27f   :  { %v1181_v2 = vpop.f32.mrf.mxu1 }
 0x280   :  { %v2143_v3 = vadd.f32 %v1180_v36, %v442_v63  ;;  %v668_v29 = vpack.c.bf16 %v1180_v36, %v1177_v1  ;;  %v666_v63 = vpack.c.bf16 %v1168_v60, %v1165_v19  ;;  %v2598_v1 = vpack.c.bf16 %v2012_v46, %v2005_v13  ;;  %v2625_v36 = vld [vmem:[#allocation40_spill] sm:$0xff] }
 0x281   :  { %v1182_v57 = vpop.f32.mrf.mxu1  ;;  %v2600_v19 = vpack.c.bf16 %v1980_v7, %v1973_v55  ;;  %v2602_v13 = vpack.c.bf16 %v1964_v41, %v1957_v27  ;;  %v2603_v46 = vpack.c.bf16 %v2076_v28, %v2069_v16  ;;  %v2620_v27 = vld [vmem:[#allocation59_spill] sm:$0xff]  ;;  %v2621_v41 = vld [vmem:[#allocation61_spill] sm:$0xff] }
 0x282   :  { %v1183_v15 = vadd.f32 %v1182_v57, %v1181_v2  ;;  %v665_v2 = vpack.c.bf16 %v1162_v24, %v1159_v53  ;;  %v2601_v24 = vpack.c.bf16 %v2092_v40, %v2085_v21  ;;  %v2622_v55 = vld [vmem:[#allocation63_spill] sm:$0xff] }
 0x283   :  { %v1184_v23 = vpop.f32.mrf.mxu1 }
 0x284   :  { %v2147_v4 = vadd.f32 %v1183_v15, %v443_v52 }
 0x285   :  { %v1185_v56 = vpop.f32.mrf.mxu1 }
 0x286   :  { %v1186_v18 = vadd.f32 %v1185_v56, %v1184_v23  ;;  %v2626_v56 = vld [vmem:[#allocation42_spill] sm:$0xff] }
 0x288   :  { %v2151_v48 = vadd.f32 %v1186_v18, %v444_v14  ;;  %v669_v20 = vpack.c.bf16 %v1186_v18, %v1183_v15 }
 0x28a   :  { %1187 = vmatprep.subr.bf16.mxu0 %v669_v20 }
 0x28b   :  { %1188 = vmatpush3.bf16.msra.mxu0 %v2595_v8  ;;  %v2627_v8 = vld [vmem:[#allocation44_spill] sm:$0xff] }
 0x28c   :  { %1189 = vmatprep.subr.bf16.mxu0 %v668_v29 }
 0x28f   :  { %1190 = vmatpush3.bf16.msra.mxu0 %v2596_v9 }
 0x290   :  { %1191 = vmatprep.subr.bf16.mxu0 %v667_v62 }
 0x293   :  { %1192 = vmatpush3.bf16.msra.mxu0 %v2597_v58 }
 0x294   :  { %1193 = vmatprep.subr.bf16.mxu0 %v666_v63 }
 0x297   :  { %1194 = vmatpush3.bf16.msra.mxu0 %v2598_v1  ;;  %v2628_v1 = vld [vmem:[#allocation46_spill] sm:$0xff] }
 0x298   :  { %1195 = vmatprep.subr.bf16.mxu0 %v665_v2 }
 0x29b   :  { %1196 = vmatpush3.bf16.msra.mxu0 %v2599_v32 }
 0x29c   :  { %1197 = vmatprep.subr.bf16.mxu0 %v664_v17 }
 0x29f   :  { %1198 = vmatpush3.bf16.msra.mxu0 %v2600_v19 }
 0x2a0   :  { %1199 = vmatprep.subr.bf16.mxu0 %v2601_v24 }
 0x2a3   :  { %1200 = vmatpush3.bf16.msra.mxu0 %v2602_v13 }
 0x2a4   :  { %1201 = vmatprep.subr.bf16.mxu0 %v2603_v46  ;;  %v2629_v46 = vld [vmem:[#allocation48_spill] sm:$0xff] }
 0x2a7   :  { %1202 = vmatpush3.bf16.msra.mxu0 %v2604_v44 }
 0x2aa   :  { %703 = vmatmul.mubr.bf16.vlgmr.msra.gmra.mxu0 %v1585_v50  ;;  %v2605_v50 = vld [vmem:[#allocation60_spill] sm:$0xff] }
 0x2ab   :  { %710 = vmatprep.mubr.bf16.mxu0 %v2505_v30  ;;  %v2606_v30 = vld [vmem:[#allocation62_spill] sm:$0xff] }
 0x2b2   :  { %711 = vmatmul.mubr.bf16.gmra.mxu0 %v2506_v33  ;;  %v2607_v33 = vld [vmem:[#allocation22_spill] sm:$0xff] }
 0x2b3   :  { %718 = vmatprep.mubr.bf16.mxu0 %v2507_v35  ;;  %v2608_v35 = vld [vmem:[#allocation35_spill] sm:$0xff] }
 0x2ba   :  { %719 = vmatmul.mubr.bf16.gmra.mxu0 %v2508_v39  ;;  %v2609_v39 = vld [vmem:[#allocation37_spill] sm:$0xff] }
 0x2bb   :  { %726 = vmatprep.mubr.bf16.mxu0 %v2509_v42  ;;  %v2610_v42 = vld [vmem:[#allocation39_spill] sm:$0xff] }
 0x2c2   :  { %727 = vmatmul.mubr.bf16.gmra.mxu0 %v2510_v45  ;;  %v2611_v45 = vld [vmem:[#allocation41_spill] sm:$0xff] }
 0x2c3   :  { %734 = vmatprep.mubr.bf16.mxu0 %v2511_v47  ;;  %v2612_v47 = vld [vmem:[#allocation43_spill] sm:$0xff] }
 0x2ca   :  { %735 = vmatmul.mubr.bf16.gmra.mxu0 %v2512_v49  ;;  %v2613_v49 = vld [vmem:[#allocation45_spill] sm:$0xff] }
 0x2cb   :  { %742 = vmatprep.mubr.bf16.mxu0 %v2513_v26  ;;  %v2614_v26 = vld [vmem:[#allocation47_spill] sm:$0xff] }
 0x2d2   :  { %743 = vmatmul.mubr.bf16.gmra.mxu0 %v2514_v38  ;;  %v2615_v38 = vld [vmem:[#allocation49_spill] sm:$0xff] }
 0x2d3   :  { %750 = vmatprep.mubr.bf16.mxu0 %v2515_v37  ;;  %v2616_v37 = vld [vmem:[#allocation51_spill] sm:$0xff] }
 0x2da   :  { %751 = vmatmul.mubr.bf16.gmra.mxu0 %v2516_v43  ;;  %v2617_v43 = vld [vmem:[#allocation53_spill] sm:$0xff] }
 0x2db   :  { %758 = vmatprep.mubr.bf16.mxu0 %v2605_v50 }
 0x2e2   :  { %759 = vmatmul.mubr.bf16.gmra.mxu0 %v2606_v30 }
 0x2e3   :  { %766 = vmatprep.mubr.bf16.mxu0 %v2607_v33 }
 0x2ea   :  { %767 = vmatmul.mubr.bf16.gmra.mxu0 %v2608_v35 }
 0x2eb   :  { %774 = vmatprep.mubr.bf16.mxu0 %v2609_v39  ;;  %v2630_v39 = vld [vmem:[#allocation50_spill] sm:$0xff] }
 0x2f2   :  { %775 = vmatmul.mubr.bf16.gmra.mxu0 %v2610_v42 }
 0x2f3   :  { %782 = vmatprep.mubr.bf16.mxu0 %v2611_v45 }
 0x2fa   :  { %783 = vmatmul.mubr.bf16.gmra.mxu0 %v2612_v47 }
 0x2fb   :  { %790 = vmatprep.mubr.bf16.mxu0 %v2613_v49 }
 0x302   :  { %791 = vmatmul.mubr.bf16.gmra.mxu0 %v2614_v26 }
 0x303   :  { %798 = vmatprep.mubr.bf16.mxu0 %v2615_v38  ;;  %v2631_v38 = vld [vmem:[#allocation52_spill] sm:$0xff] }
 0x30a   :  { %799 = vmatmul.mubr.bf16.gmra.mxu0 %v2616_v37 }
 0x30b   :  { %806 = vmatprep.mubr.bf16.mxu0 %v2617_v43 }
 0x312   :  { %807 = vmatmul.mubr.bf16.gmra.mxu0 %v2618_v25 }
 0x313   :  { %814 = vmatprep.mubr.bf16.mxu0 %v2619_v10 }
 0x31a   :  { %815 = vmatmul.mubr.bf16.gmra.mxu0 %v2620_v27 }
 0x31b   :  { %822 = vmatprep.mubr.bf16.mxu0 %v2621_v41  ;;  %v2632_v41 = vld [vmem:[#allocation54_spill] sm:$0xff] }
 0x322   :  { %823 = vmatmul.mubr.bf16.gmra.mxu0 %v2622_v55 }
 0x36a   :  { %v1203_v7 = vpop.f32.mrf.mxu0 }
 0x36c   :  { %v1204_v34 = vpop.f32.mrf.mxu0 }
 0x36d   :  { %v1205_v22 = vadd.f32 %v1204_v34, %v1203_v7 }
 0x36e   :  { %v1206_v12 = vpop.f32.mrf.mxu0 }
 0x36f   :  { %v831_v6 = vadd.f32 %v1205_v22, %v2623_v0  ;;  %v2633_v0 = vld [vmem:[#allocation56_spill] sm:$0xff] }
 0x370   :  { %v1207_v16 = vpop.f32.mrf.mxu0 }
 0x371   :  { %v863_v28 = vmul.f32 0.25, %v831_v6  ;;  %v1208_v21 = vadd.f32 %v1207_v16, %v1206_v12 }
 0x372   :  { %v1209_v40 = vpop.f32.mrf.mxu0 }
 0x373   :  { %895 = vst [vmem:[%s2346_s2] sm:$0xff] %v863_v28  ;;  %v832_v59 = vadd.f32 %v1208_v21, %v2624_v54  ;;  %v2634_v54 = vld [vmem:[#allocation58_spill] sm:$0xff] }
 0x374   :  { %v1210_v53 = vpop.f32.mrf.mxu0 }
 0x375   :  { %v864_v60 = vmul.f32 0.25, %v832_v59  ;;  %v1211_v5 = vadd.f32 %v1210_v53, %v1209_v40 }
 0x376   :  { %v1212_v51 = vpop.f32.mrf.mxu0 }
 0x377   :  { %896 = vst [vmem:[%s2346_s2 + $0x8] sm:$0xff] %v864_v60  ;;  %v833_v57 = vadd.f32 %v1211_v5, %v2625_v36  ;;  %v2635_v36 = vld [vmem:[#allocation33_spill] sm:$0xff] }
 0x378   :  { %v1213_v11 = vpop.f32.mrf.mxu0 }
 0x379   :  { %v865_v52 = vmul.f32 0.25, %v833_v57  ;;  %v1214_v15 = vadd.f32 %v1213_v11, %v1212_v51 }
 0x37a   :  { %v1215_v23 = vpop.f32.mrf.mxu0 }
 0x37b   :  { %897 = vst [vmem:[%s2346_s2 + $0x10] sm:$0xff] %v865_v52  ;;  %v834_v31 = vadd.f32 %v1214_v15, %v2626_v56  ;;  %v2636_v56 = vld [vmem:[#allocation34_spill] sm:$0xff] }
 0x37c   :  { %v1216_v14 = vpop.f32.mrf.mxu0 }
 0x37d   :  { %v866_v18 = vmul.f32 0.25, %v834_v31  ;;  %v1217_v20 = vadd.f32 %v1216_v14, %v1215_v23 }
 0x37e   :  { %v1218_v29 = vpop.f32.mrf.mxu0 }
 0x37f   :  { %898 = vst [vmem:[%s2346_s2 + $0x18] sm:$0xff] %v866_v18  ;;  %v835_v62 = vadd.f32 %v1217_v20, %v2627_v8  ;;  %v2637_v8 = vld [vmem:[#allocation29_spill] sm:$0xff] }
 0x380   :  { %v1219_v9 = vpop.f32.mrf.mxu0 }
 0x381   :  { %v867_v63 = vmul.f32 0.25, %v835_v62  ;;  %v1220_v58 = vadd.f32 %v1219_v9, %v1218_v29 }
 0x382   :  { %v1221_v2 = vpop.f32.mrf.mxu0 }
 0x383   :  { %899 = vst [vmem:[%s2346_s2 + $0x20] sm:$0xff] %v867_v63  ;;  %v836_v17 = vadd.f32 %v1220_v58, %v2628_v1  ;;  %v2638_v1 = vld [vmem:[#allocation30_spill] sm:$0xff] }
 0x384   :  { %v1222_v32 = vpop.f32.mrf.mxu0 }
 0x385   :  { %v868_v19 = vmul.f32 0.25, %v836_v17  ;;  %v1223_v24 = vadd.f32 %v1222_v32, %v1221_v2 }
 0x386   :  { %v1224_v13 = vpop.f32.mrf.mxu0 }
 0x387   :  { %900 = vst [vmem:[%s2346_s2 + $0x28] sm:$0xff] %v868_v19  ;;  %v837_v44 = vadd.f32 %v1223_v24, %v2629_v46  ;;  %v2639_v46 = vld [vmem:[#allocation25_spill] sm:$0xff] }
 0x388   :  { %v1225_v50 = vpop.f32.mrf.mxu0 }
 0x389   :  { %v869_v30 = vmul.f32 0.25, %v837_v44  ;;  %v1226_v33 = vadd.f32 %v1225_v50, %v1224_v13 }
 0x38a   :  { %v1227_v35 = vpop.f32.mrf.mxu0 }
 0x38b   :  { %901 = vst [vmem:[%s2346_s2 + $0x30] sm:$0xff] %v869_v30  ;;  %v838_v42 = vadd.f32 %v1226_v33, %v2630_v39  ;;  %v2640_v39 = vld [vmem:[#allocation26_spill] sm:$0xff] }
 0x38c   :  { %v1228_v45 = vpop.f32.mrf.mxu0 }
 0x38d   :  { %v870_v47 = vmul.f32 0.25, %v838_v42  ;;  %v1229_v49 = vadd.f32 %v1228_v45, %v1227_v35 }
 0x38e   :  { %v1230_v26 = vpop.f32.mrf.mxu0 }
 0x38f   :  { %902 = vst [vmem:[%s2346_s2 + $0x38] sm:$0xff] %v870_v47  ;;  %v839_v37 = vadd.f32 %v1229_v49, %v2631_v38  ;;  %v2641_v38 = vld [vmem:[#allocation20_spill] sm:$0xff] }
 0x390   :  { %v1231_v43 = vpop.f32.mrf.mxu0 }
 0x391   :  { %v871_v25 = vmul.f32 0.25, %v839_v37  ;;  %v1232_v10 = vadd.f32 %v1231_v43, %v1230_v26 }
 0x392   :  { %v1233_v27 = vpop.f32.mrf.mxu0 }
 0x393   :  { %903 = vst [vmem:[%s2346_s2 + $0x40] sm:$0xff] %v871_v25  ;;  %v840_v55 = vadd.f32 %v1232_v10, %v2632_v41  ;;  %v2642_v41 = vld [vmem:[#allocation21_spill] sm:$0xff] }
 0x394   :  { %v1234_v7 = vpop.f32.mrf.mxu0 }
 0x395   :  { %v872_v34 = vmul.f32 0.25, %v840_v55  ;;  %v1235_v22 = vadd.f32 %v1234_v7, %v1233_v27 }
 0x396   :  { %v1236_v12 = vpop.f32.mrf.mxu0 }
 0x397   :  { %904 = vst [vmem:[%s2346_s2 + $0x48] sm:$0xff] %v872_v34  ;;  %v841_v6 = vadd.f32 %v1235_v22, %v2633_v0  ;;  %v2643_v0 = vld [vmem:[#allocation16_spill] sm:$0xff] }
 0x398   :  { %v1237_v16 = vpop.f32.mrf.mxu0 }
 0x399   :  { %v873_v28 = vmul.f32 0.25, %v841_v6  ;;  %v1238_v21 = vadd.f32 %v1237_v16, %v1236_v12 }
 0x39a   :  { %v1239_v40 = vpop.f32.mrf.mxu0 }
 0x39b   :  { %905 = vst [vmem:[%s2346_s2 + $0x50] sm:$0xff] %v873_v28  ;;  %v842_v59 = vadd.f32 %v1238_v21, %v2634_v54  ;;  %v2644_v54 = vld [vmem:[#allocation17_spill] sm:$0xff] }
 0x39c   :  { %v1240_v53 = vpop.f32.mrf.mxu0 }
 0x39d   :  { %v874_v60 = vmul.f32 0.25, %v842_v59  ;;  %v1241_v5 = vadd.f32 %v1240_v53, %v1239_v40 }
 0x39e   :  { %v1242_v51 = vpop.f32.mrf.mxu0 }
 0x39f   :  { %906 = vst [vmem:[%s2346_s2 + $0x58] sm:$0xff] %v874_v60  ;;  %v843_v57 = vadd.f32 %v1241_v5, %v2635_v36  ;;  %v2645_v36 = vld [vmem:[#allocation12_spill] sm:$0xff] }
 0x3a0   :  { %v1243_v11 = vpop.f32.mrf.mxu0 }
 0x3a1   :  { %v875_v52 = vmul.f32 0.25, %v843_v57  ;;  %v1244_v15 = vadd.f32 %v1243_v11, %v1242_v51 }
 0x3a2   :  { %v1245_v23 = vpop.f32.mrf.mxu0 }
 0x3a3   :  { %907 = vst [vmem:[%s2346_s2 + $0x60] sm:$0xff] %v875_v52  ;;  %v844_v31 = vadd.f32 %v1244_v15, %v2636_v56  ;;  %v2646_v56 = vld [vmem:[#allocation13_spill] sm:$0xff] }
 0x3a4   :  { %v1246_v14 = vpop.f32.mrf.mxu0 }
 0x3a5   :  { %v876_v18 = vmul.f32 0.25, %v844_v31  ;;  %v1247_v20 = vadd.f32 %v1246_v14, %v1245_v23 }
 0x3a6   :  { %v1248_v29 = vpop.f32.mrf.mxu0 }
 0x3a7   :  { %908 = vst [vmem:[%s2346_s2 + $0x68] sm:$0xff] %v876_v18  ;;  %v845_v62 = vadd.f32 %v1247_v20, %v2637_v8  ;;  %v2647_v8 = vld [vmem:[#allocation8_spill] sm:$0xff] }
 0x3a8   :  { %v1249_v9 = vpop.f32.mrf.mxu0 }
 0x3a9   :  { %v877_v63 = vmul.f32 0.25, %v845_v62  ;;  %v1250_v58 = vadd.f32 %v1249_v9, %v1248_v29 }
 0x3aa   :  { %v1251_v2 = vpop.f32.mrf.mxu0 }
 0x3ab   :  { %909 = vst [vmem:[%s2346_s2 + $0x70] sm:$0xff] %v877_v63  ;;  %v846_v17 = vadd.f32 %v1250_v58, %v2638_v1  ;;  %v2648_v1 = vld [vmem:[#allocation9_spill] sm:$0xff] }
 0x3ac   :  { %v1252_v32 = vpop.f32.mrf.mxu0 }
 0x3ad   :  { %v878_v19 = vmul.f32 0.25, %v846_v17  ;;  %v1253_v24 = vadd.f32 %v1252_v32, %v1251_v2 }
 0x3ae   :  { %v1254_v13 = vpop.f32.mrf.mxu0 }
 0x3af   :  { %910 = vst [vmem:[%s2346_s2 + $0x78] sm:$0xff] %v878_v19  ;;  %v847_v44 = vadd.f32 %v1253_v24, %v2639_v46  ;;  %v2649_v46 = vld [vmem:[#allocation4_spill] sm:$0xff] }
 0x3b0   :  { %v1255_v50 = vpop.f32.mrf.mxu0 }
 0x3b1   :  { %v879_v30 = vmul.f32 0.25, %v847_v44  ;;  %v1256_v33 = vadd.f32 %v1255_v50, %v1254_v13 }
 0x3b2   :  { %v1257_v35 = vpop.f32.mrf.mxu0 }
 0x3b3   :  { %911 = vst [vmem:[%s2346_s2 + $0x80] sm:$0xff] %v879_v30  ;;  %v848_v42 = vadd.f32 %v1256_v33, %v2640_v39  ;;  %v2650_v39 = vld [vmem:[#allocation5_spill] sm:$0xff] }
 0x3b4   :  { %v1258_v45 = vpop.f32.mrf.mxu0 }
 0x3b5   :  { %v880_v47 = vmul.f32 0.25, %v848_v42  ;;  %v1259_v49 = vadd.f32 %v1258_v45, %v1257_v35 }
 0x3b6   :  { %v1260_v26 = vpop.f32.mrf.mxu0 }
 0x3b7   :  { %912 = vst [vmem:[%s2346_s2 + $0x88] sm:$0xff] %v880_v47  ;;  %v849_v37 = vadd.f32 %v1259_v49, %v2641_v38 }
 0x3b8   :  { %v1261_v43 = vpop.f32.mrf.mxu0 }
 0x3b9   :  { %v881_v25 = vmul.f32 0.25, %v849_v37  ;;  %v1262_v10 = vadd.f32 %v1261_v43, %v1260_v26 }
 0x3ba   :  { %v1263_v27 = vpop.f32.mrf.mxu0 }
 0x3bb   :  { %913 = vst [vmem:[%s2346_s2 + $0x90] sm:$0xff] %v881_v25  ;;  %v850_v55 = vadd.f32 %v1262_v10, %v2642_v41 }
 0x3bc   :  { %v1264_v7 = vpop.f32.mrf.mxu0 }
 0x3bd   :  { %v882_v34 = vmul.f32 0.25, %v850_v55  ;;  %v1265_v22 = vadd.f32 %v1264_v7, %v1263_v27 }
 0x3be   :  { %v1266_v12 = vpop.f32.mrf.mxu0 }
 0x3bf   :  { %914 = vst [vmem:[%s2346_s2 + $0x98] sm:$0xff] %v882_v34  ;;  %v851_v6 = vadd.f32 %v1265_v22, %v2643_v0 }
 0x3c0   :  { %v1267_v16 = vpop.f32.mrf.mxu0 }
 0x3c1   :  { %v883_v28 = vmul.f32 0.25, %v851_v6  ;;  %v1268_v21 = vadd.f32 %v1267_v16, %v1266_v12 }
 0x3c2   :  { %v1269_v40 = vpop.f32.mrf.mxu0 }
 0x3c3   :  { %915 = vst [vmem:[%s2346_s2 + $0xa0] sm:$0xff] %v883_v28  ;;  %v852_v59 = vadd.f32 %v1268_v21, %v2644_v54 }
 0x3c4   :  { %v1270_v53 = vpop.f32.mrf.mxu0 }
 0x3c5   :  { %v884_v60 = vmul.f32 0.25, %v852_v59  ;;  %v1271_v5 = vadd.f32 %v1270_v53, %v1269_v40 }
 0x3c6   :  { %v1272_v51 = vpop.f32.mrf.mxu0 }
 0x3c7   :  { %916 = vst [vmem:[%s2346_s2 + $0xa8] sm:$0xff] %v884_v60  ;;  %v853_v57 = vadd.f32 %v1271_v5, %v2645_v36 }
 0x3c8   :  { %v1273_v11 = vpop.f32.mrf.mxu0 }
 0x3c9   :  { %v885_v52 = vmul.f32 0.25, %v853_v57  ;;  %v1274_v15 = vadd.f32 %v1273_v11, %v1272_v51 }
 0x3ca   :  { %v1275_v23 = vpop.f32.mrf.mxu0 }
 0x3cb   :  { %917 = vst [vmem:[%s2346_s2 + $0xb0] sm:$0xff] %v885_v52  ;;  %v854_v31 = vadd.f32 %v1274_v15, %v2646_v56 }
 0x3cc   :  { %v1276_v14 = vpop.f32.mrf.mxu0 }
 0x3cd   :  { %v886_v18 = vmul.f32 0.25, %v854_v31  ;;  %v1277_v20 = vadd.f32 %v1276_v14, %v1275_v23 }
 0x3ce   :  { %v1278_v29 = vpop.f32.mrf.mxu0 }
 0x3cf   :  { %918 = vst [vmem:[%s2346_s2 + $0xb8] sm:$0xff] %v886_v18  ;;  %v855_v62 = vadd.f32 %v1277_v20, %v2647_v8 }
 0x3d0   :  { %v1279_v9 = vpop.f32.mrf.mxu0 }
 0x3d1   :  { %v887_v63 = vmul.f32 0.25, %v855_v62  ;;  %v1280_v58 = vadd.f32 %v1279_v9, %v1278_v29 }
 0x3d2   :  { %v1281_v2 = vpop.f32.mrf.mxu0 }
 0x3d3   :  { %919 = vst [vmem:[%s2346_s2 + $0xc0] sm:$0xff] %v887_v63  ;;  %v856_v17 = vadd.f32 %v1280_v58, %v2648_v1 }
 0x3d4   :  { %v1282_v32 = vpop.f32.mrf.mxu0 }
 0x3d5   :  { %v888_v19 = vmul.f32 0.25, %v856_v17  ;;  %v1283_v24 = vadd.f32 %v1282_v32, %v1281_v2 }
 0x3d6   :  { %v1284_v13 = vpop.f32.mrf.mxu0 }
 0x3d7   :  { %920 = vst [vmem:[%s2346_s2 + $0xc8] sm:$0xff] %v888_v19  ;;  %v857_v44 = vadd.f32 %v1283_v24, %v2649_v46 }
 0x3d8   :  { %v1285_v50 = vpop.f32.mrf.mxu0 }
 0x3d9   :  { %v889_v30 = vmul.f32 0.25, %v857_v44  ;;  %v1286_v33 = vadd.f32 %v1285_v50, %v1284_v13 }
 0x3da   :  { %v1287_v35 = vpop.f32.mrf.mxu0 }
 0x3db   :  { %921 = vst [vmem:[%s2346_s2 + $0xd0] sm:$0xff] %v889_v30  ;;  %v858_v42 = vadd.f32 %v1286_v33, %v2650_v39 }
 0x3dc   :  { %v1288_v45 = vpop.f32.mrf.mxu0 }
 0x3dd   :  { %v890_v47 = vmul.f32 0.25, %v858_v42  ;;  %v1289_v49 = vadd.f32 %v1288_v45, %v1287_v35 }
 0x3de   :  { %v1290_v26 = vpop.f32.mrf.mxu0 }
 0x3df   :  { %922 = vst [vmem:[%s2346_s2 + $0xd8] sm:$0xff] %v890_v47  ;;  %v859_v38 = vadd.f32 %v1289_v49, %v2139_v61 }
 0x3e0   :  { %v1291_v37 = vpop.f32.mrf.mxu0 }
 0x3e1   :  { %v891_v43 = vmul.f32 0.25, %v859_v38  ;;  %v1292_v25 = vadd.f32 %v1291_v37, %v1290_v26 }
 0x3e2   :  { %v1293_v10 = vpop.f32.mrf.mxu0 }
 0x3e3   :  { %923 = vst [vmem:[%s2346_s2 + $0xe0] sm:$0xff] %v891_v43  ;;  %v860_v27 = vadd.f32 %v1292_v25, %v2143_v3 }
 0x3e4   :  { %v1294_v41 = vpop.f32.mrf.mxu0 }
 0x3e5   :  { %v892_v55 = vmul.f32 0.25, %v860_v27  ;;  %v1295_v7 = vadd.f32 %v1294_v41, %v1293_v10 }
 0x3e6   :  { %v1296_v34 = vpop.f32.mrf.mxu0 }
 0x3e7   :  { %924 = vst [vmem:[%s2346_s2 + $0xe8] sm:$0xff] %v892_v55  ;;  %v861_v61 = vadd.f32 %v1295_v7, %v2147_v4 }
 0x3e8   :  { %v1297_v22 = vpop.f32.mrf.mxu0 }
 0x3e9   :  { %v893_v12 = vmul.f32 0.25, %v861_v61  ;;  %v1298_v0 = vadd.f32 %v1297_v22, %v1296_v34 }
 0x3eb   :  { %925 = vst [vmem:[%s2346_s2 + $0xf0] sm:$0xff] %v893_v12  ;;  %v862_v6 = vadd.f32 %v1298_v0, %v2151_v48 }
 0x3ed   :  { %v894_v3 = vmul.f32 0.25, %v862_v6 }
 0x3ef   :  { %926 = vst [vmem:[%s2346_s2 + $0xf8] sm:$0xff] %v894_v3 }

</bundles_post_ra>
